<compile_context>
chip_gen: v6e
topology: v6e:2x2x1
jax: 0.10.0
libtpu: 0.0.40
codegen_flags: <defaults>
</compile_context>

<pallas_src>
import functools

import numpy as np
import jax
import jax.numpy as jnp
from jax.experimental import pallas as pl
from jax.experimental.pallas import tpu as pltpu

N_HEAD = 4    # hard-coded in EncoderLayer: MultiHeadAttention(config, n_head=4, d_head=64)
D_HEAD = 64


# ----------------------------- in-kernel helpers -----------------------------

def _layer_norm(x, g, b, eps):
    # PyTorch nn.LayerNorm: biased variance over the last dim.
    mu = jnp.mean(x, axis=-1, keepdims=True)
    var = jnp.mean((x - mu) * (x - mu), axis=-1, keepdims=True)
    return (x - mu) * jax.lax.rsqrt(var + eps) * g + b


def _gelu(x):
    # TODO(synk): PyTorch F.gelu default is the exact erf-GELU; the tanh
    # approximation is used here (max abs deviation ~1e-3).
    c = float(np.sqrt(2.0 / np.pi))
    return 0.5 * x * (1.0 + jnp.tanh(c * (x + 0.044715 * x * x * x)))


# ------------------------- fused encoder-stack kernel -------------------------

def encoder_stack_kernel(x_ref, pad_ref,
                         wqkv_ref, bqkv_ref, wo_ref, bo_ref,
                         g1_ref, be1_ref, wf1_ref, bf1_ref,
                         wf2_ref, bf2_ref, g2_ref, be2_ref,
                         out_ref, attn_ref, *, eps, n_head, d_head):
    layer = pl.program_id(1)

    # Layer 0 seeds the resident activation block from the embedded input.
    @pl.when(layer == 0)
    def _():
        out_ref[...] = x_ref[...]

    B, S, D = out_ref.shape
    dh = n_head * d_head
    cd = wqkv_ref.dtype                       # matmul-input dtype (f32 or bf16)

    x = out_ref[...]                          # (B, S, D) current activations (f32)
    x2 = x.reshape(B * S, D)

    def mm(a, w_ref):
        w = w_ref[...]
        return jnp.dot(a.astype(w.dtype), w, preferred_element_type=jnp.float32)

    # Fused Q|K|V projection; W_q / b_q already carry the 1/sqrt(d_head) scale.
    qkv = mm(x2, wqkv_ref) + bqkv_ref[...]    # (B*S, 3*dh), f32
    q, k, v = qkv[:, :dh], qkv[:, dh:2 * dh], qkv[:, 2 * dh:]

    # Scores for all heads: batched-over-batch matmul per head, stacked over heads
    # so mask / softmax / store operate on the full (B, H, S, S) block at once.
    scores_h = []
    for h in range(n_head):
        sl = slice(h * d_head, (h + 1) * d_head)
        qh = q[:, sl].reshape(B, S, d_head).astype(cd)
        kh = k[:, sl].reshape(B, S, d_head).astype(cd)
        scores_h.append(jnp.einsum('bqd,bkd->bqk', qh, kh,
                                   preferred_element_type=jnp.float32))
    scores = jnp.stack(scores_h, axis=1)      # (B, H, S, S)

    key_pad = pad_ref[...]                    # (B, S), 1.0 where key token is pad
    scores = jnp.where(key_pad[:, None, None, :] > 0.5, jnp.float32(-1e9), scores)

    # softmax over keys (dropout is identity in eval mode)
    scores = scores - jnp.max(scores, axis=-1, keepdims=True)
    e = jnp.exp(scores)
    denom = jnp.sum(e, axis=-1, keepdims=True)
    prob = e * pl.reciprocal(denom, approx=True)
    attn_ref[...] = prob                      # single store of all heads

    # Per-head context, concatenated -> single K=256 output projection.
    ctx_h = []
    for h in range(n_head):
        sl = slice(h * d_head, (h + 1) * d_head)
        vh = v[:, sl].reshape(B, S, d_head).astype(cd)
        ctx_h.append(jnp.einsum('bqk,bkd->bqd', prob[:, h].astype(cd), vh,
                                preferred_element_type=jnp.float32))
    ctx = jnp.concatenate(ctx_h, axis=-1).reshape(B * S, dh)
    att_out = mm(ctx, wo_ref) + bo_ref[...]   # (B*S, D)

    # residual + LayerNorm 1
    h1 = _layer_norm(x2 + att_out, g1_ref[...], be1_ref[...], eps)

    # PoswiseFeedForwardNet: conv1d(k=1) -> gelu -> conv1d(k=1), as matmuls.
    ff = _gelu(mm(h1, wf1_ref) + bf1_ref[...])
    ff = mm(ff, wf2_ref) + bf2_ref[...]

    # residual + LayerNorm 2; result stays resident for the next layer.
    out_ref[...] = _layer_norm(ff + h1, g2_ref[...], be2_ref[...], eps).reshape(B, S, D)


# ------------------------------ host-side wrapper ------------------------------

def stack_layer_params(layers, matmul_dtype=jnp.float32):
    """Stack per-layer params with a leading layer axis; fuse Q|K|V and fold the
    1/sqrt(d_head) attention scale into W_q / b_q. Large matmul weights are cast
    to `matmul_dtype` (bf16 recommended on v6e/v7x); biases & LayerNorm stay f32."""
    scale = np.float32(1.0 / np.sqrt(D_HEAD))
    cols = [[] for _ in range(12)]
    for (wq, bq, wk, bk, wv, bv, wo, bo,
         g1, be1, wf1, bf1, wf2, bf2, g2, be2) in layers:
        wqkv = jnp.concatenate([wq * scale, wk, wv], axis=1)
        bqkv = jnp.concatenate([bq * scale, bk, bv], axis=1)
        vals = [wqkv.astype(matmul_dtype), bqkv,
                wo.astype(matmul_dtype), bo, g1, be1,
                wf1.astype(matmul_dtype), bf1,
                wf2.astype(matmul_dtype), bf2, g2, be2]
        for c, v in zip(cols, vals):
            c.append(v)
    return [jnp.stack(c, axis=0) for c in cols]


def run_encoder_stack(x, key_pad, stacked, eps, *, batch_blocks=1):
    """x: (B, S, D) f32 embedded inputs; key_pad: (B, S) f32 (1.0 where pad)."""
    B, S, D = x.shape
    L = stacked[0].shape[0]
    assert B % batch_blocks == 0
    Bb = B // batch_blocks

    kernel = functools.partial(encoder_stack_kernel, eps=eps,
                               n_head=N_HEAD, d_head=D_HEAD)

    def wspec(arr):
        zeros = (0,) * (arr.ndim - 1)
        return pl.BlockSpec((None,) + arr.shape[1:],
                            lambda b, l, _z=zeros: (l,) + _z)

    in_specs = [
        pl.BlockSpec((Bb, S, D), lambda b, l: (b, 0, 0)),
        pl.BlockSpec((Bb, S), lambda b, l: (b, 0)),
    ] + [wspec(w) for w in stacked]

    out_specs = [
        # Activation block: same index across the (innermost) layer axis -> stays
        # resident in VMEM for the whole stack, single HBM writeback at the end.
        pl.BlockSpec((Bb, S, D), lambda b, l: (b, 0, 0)),
        pl.BlockSpec((None, Bb, N_HEAD, S, S), lambda b, l: (l, b, 0, 0, 0)),
    ]
    out_shape = [
        jax.ShapeDtypeStruct((B, S, D), jnp.float32),
        jax.ShapeDtypeStruct((L, B, N_HEAD, S, S), jnp.float32),
    ]

    return pl.pallas_call(
        kernel,
        grid=(batch_blocks, L),
        in_specs=in_specs,
        out_specs=out_specs,
        out_shape=out_shape,
        compiler_params=pltpu.CompilerParams(
            dimension_semantics=("parallel", "arbitrary")),
    )(x, key_pad, *stacked)


# ------------------------------ Encoder (glue) --------------------------------

def get_sinusoid_encoding_table(n_seq, d_hidn):
    pos = np.arange(n_seq, dtype=np.float64)[:, None]
    i = np.arange(d_hidn, dtype=np.float64)[None, :]
    angle = pos / np.power(10000.0, 2.0 * (np.floor(i / 2.0)) / d_hidn)
    table = angle.copy()
    table[:, 0::2] = np.sin(angle[:, 0::2])
    table[:, 1::2] = np.cos(angle[:, 1::2])
    return jnp.asarray(table, dtype=jnp.float32)


def encoder_forward(inputs, params, config, *, batch_blocks=1,
                    matmul_dtype=jnp.float32):
    B, S = inputs.shape
    i_pad = config["i_pad"]

    # positions = arange(S)+1, zeroed at pad positions (embedding gathers = JAX glue)
    positions = jnp.broadcast_to(jnp.arange(S, dtype=inputs.dtype) + 1, (B, S))
    positions = jnp.where(inputs == i_pad, jnp.zeros_like(positions), positions)
    x = params["enc_emb"][inputs] + params["pos_emb"][positions]

    # get_attn_pad_mask: only the (B, S) key-pad vector is shipped to the kernel.
    key_pad = (inputs == i_pad).astype(jnp.float32)

    stacked = stack_layer_params(params["layers"], matmul_dtype=matmul_dtype)
    out, attn = run_encoder_stack(x, key_pad, stacked,
                                  config["layer_norm_epsilon"],
                                  batch_blocks=batch_blocks)
    attn_probs = [attn[l] for l in range(len(params["layers"]))]
    return out, attn_probs


# ------------------------------ params / reference ----------------------------

def init_layer_params(key, d_hidn, d_ff):
    dh = N_HEAD * D_HEAD
    ks = jax.random.split(key, 12)

    def lin(kw, kb, din, dout):
        w = (jax.random.normal(kw, (din, dout), jnp.float32) * 0.02)
        b = (jax.random.normal(kb, (1, dout), jnp.float32) * 0.02)
        return w, b

    wq, bq = lin(ks[0], ks[1], d_hidn, dh)
    wk, bk = lin(ks[2], ks[3], d_hidn, dh)
    wv, bv = lin(ks[4], ks[5], d_hidn, dh)
    wo, bo = lin(ks[6], ks[7], dh, d_hidn)
    g1 = jnp.ones((1, d_hidn), jnp.float32)
    be1 = jnp.zeros((1, d_hidn), jnp.float32)
    wf1, bf1 = lin(ks[8], ks[9], d_hidn, d_ff)    # Conv1d(d_hidn->d_ff, k=1)
    wf2, bf2 = lin(ks[10], ks[11], d_ff, d_hidn)  # Conv1d(d_ff->d_hidn, k=1)
    g2 = jnp.ones((1, d_hidn), jnp.float32)
    be2 = jnp.zeros((1, d_hidn), jnp.float32)
    return [wq, bq, wk, bk, wv, bv, wo, bo, g1, be1,
            wf1, bf1, wf2, bf2, g2, be2]


def encoder_reference(inputs, params, config):
    """Plain-JAX mirror of the same math, for correctness cross-check."""
    B, S = inputs.shape
    i_pad = config["i_pad"]
    eps = config["layer_norm_epsilon"]

    positions = jnp.broadcast_to(jnp.arange(S, dtype=inputs.dtype) + 1, (B, S))
    positions = jnp.where(inputs == i_pad, jnp.zeros_like(positions), positions)
    x = params["enc_emb"][inputs] + params["pos_emb"][positions]
    key_pad = inputs == i_pad
    scale = 1.0 / np.sqrt(D_HEAD)

    attn_probs = []
    for (wq, bq, wk, bk, wv, bv, wo, bo, g1, be1,
         wf1, bf1, wf2, bf2, g2, be2) in params["layers"]:
        def split_heads(t):
            return t.reshape(B, S, N_HEAD, D_HEAD).transpose(0, 2, 1, 3)
        q = split_heads(x @ wq + bq)
        k = split_heads(x @ wk + bk)
        v = split_heads(x @ wv + bv)
        scores = jnp.einsum('bhqd,bhkd->bhqk', q, k) * scale
        scores = jnp.where(key_pad[:, None, None, :], -1e9, scores)
        prob = jax.nn.softmax(scores, axis=-1)
        attn_probs.append(prob)
        ctx = jnp.einsum('bhqk,bhkd->bhqd', prob, v)
        ctx = ctx.transpose(0, 2, 1, 3).reshape(B, S, N_HEAD * D_HEAD)
        att = ctx @ wo + bo
        h1 = _layer_norm(x + att, g1, be1, eps)
        ff = _gelu(h1 @ wf1 + bf1)
        ff = ff @ wf2 + bf2
        x = _layer_norm(ff + h1, g2, be2, eps)
    return x, attn_probs


# ----------------------------------- main -------------------------------------

if __name__ == "__main__":
    config = dict(
        n_enc_vocab=100,
        n_enc_seq=8,
        d_hidn=32,
        d_ff=128,
        n_layer=2,
        i_pad=0,
        layer_norm_epsilon=1e-12,
    )

    B, S = 2, config["n_enc_seq"]
    key = jax.random.PRNGKey(0)
    k_in, k_emb, *k_layers = jax.random.split(key, 2 + config["n_layer"])

    # token ids in [1, vocab); add some pad tokens to exercise the attention mask
    inputs = jax.random.randint(k_in, (B, S), 1, config["n_enc_vocab"], dtype=jnp.int32)
    inputs = inputs.at[1, -2:].set(config["i_pad"])

    params = {
        "enc_emb": jax.random.normal(
            k_emb, (config["n_enc_vocab"], config["d_hidn"]), jnp.float32) * 0.02,
        "pos_emb": get_sinusoid_encoding_table(config["n_enc_seq"] + 1, config["d_hidn"]),
        "layers": [init_layer_params(k, config["d_hidn"], config["d_ff"])
                   for k in k_layers],
    }

    # f32 matmul inputs by default (closest to PyTorch numerics); pass
    # matmul_dtype=jnp.bfloat16 on v6e/v7x, and batch_blocks=2 on v7x to keep
    # both TensorCores busy at larger batch sizes.
    outputs, attn_probs = encoder_forward(inputs, params, config)
    outputs = jax.block_until_ready(outputs)
    attn_probs = [jax.block_until_ready(a) for a in attn_probs]

    assert outputs.shape == (B, S, config["d_hidn"]), outputs.shape
    assert len(attn_probs) == config["n_layer"]
    assert attn_probs[0].shape == (B, N_HEAD, S, S), attn_probs[0].shape
    assert bool(jnp.all(jnp.isfinite(outputs)))
    # attention rows sum to 1 (loose tol: approx-reciprocal softmax normalizer)
    assert bool(jnp.allclose(jnp.sum(attn_probs[0], axis=-1), 1.0, atol=1e-2))

    # cross-check against a plain-JAX reference of the same math
    ref_out, ref_attn = encoder_reference(inputs, params, config)
    assert bool(jnp.allclose(outputs, ref_out, atol=2e-2, rtol=2e-2)), (
        float(jnp.max(jnp.abs(outputs - ref_out))))
    for a, r in zip(attn_probs, ref_attn):
        assert bool(jnp.allclose(a, r, atol=2e-2)), float(jnp.max(jnp.abs(a - r)))

    print("KERNEL_OK")
</pallas_src>

<mosaic_0001>
module attributes {stable_mosaic.version = 11 : i64} {
  func.func @encoder_stack_kernel(%arg0: i32, %arg1: i32, %arg2: memref<2x8x32xf32, #tpu.memory_space<vmem>>, %arg3: memref<2x8xf32, #tpu.memory_space<vmem>>, %arg4: memref<1x32x768xf32, #tpu.memory_space<vmem>>, %arg5: memref<1x1x768xf32, #tpu.memory_space<vmem>>, %arg6: memref<1x256x32xf32, #tpu.memory_space<vmem>>, %arg7: memref<1x1x32xf32, #tpu.memory_space<vmem>>, %arg8: memref<1x1x32xf32, #tpu.memory_space<vmem>>, %arg9: memref<1x1x32xf32, #tpu.memory_space<vmem>>, %arg10: memref<1x32x128xf32, #tpu.memory_space<vmem>>, %arg11: memref<1x1x128xf32, #tpu.memory_space<vmem>>, %arg12: memref<1x128x32xf32, #tpu.memory_space<vmem>>, %arg13: memref<1x1x32xf32, #tpu.memory_space<vmem>>, %arg14: memref<1x1x32xf32, #tpu.memory_space<vmem>>, %arg15: memref<1x1x32xf32, #tpu.memory_space<vmem>>, %arg16: memref<2x8x32xf32, #tpu.memory_space<vmem>>, %arg17: memref<1x2x4x8x8xf32, #tpu.memory_space<vmem>>) attributes {dimension_semantics = [#tpu.dimension_semantics<parallel>, #tpu.dimension_semantics<arbitrary>], iteration_bounds = array<i64: 1, 2>, scalar_prefetch = 0 : i64, scratch_operands = 0 : i64, tpu.core_type = #tpu.core_type<tc>, window_params = [{transform_indices = @transform_0, window_bounds = array<i64: 2, 8, 32>}, {transform_indices = @transform_1, window_bounds = array<i64: 2, 8>}, {transform_indices = @transform_2, window_bounds = array<i64: 1, 32, 768>}, {transform_indices = @transform_3, window_bounds = array<i64: 1, 1, 768>}, {transform_indices = @transform_4, window_bounds = array<i64: 1, 256, 32>}, {transform_indices = @transform_5, window_bounds = array<i64: 1, 1, 32>}, {transform_indices = @transform_6, window_bounds = array<i64: 1, 1, 32>}, {transform_indices = @transform_7, window_bounds = array<i64: 1, 1, 32>}, {transform_indices = @transform_8, window_bounds = array<i64: 1, 32, 128>}, {transform_indices = @transform_9, window_bounds = array<i64: 1, 1, 128>}, {transform_indices = @transform_10, window_bounds = array<i64: 1, 128, 32>}, {transform_indices = @transform_11, window_bounds = array<i64: 1, 1, 32>}, {transform_indices = @transform_12, window_bounds = array<i64: 1, 1, 32>}, {transform_indices = @transform_13, window_bounds = array<i64: 1, 1, 32>}, {transform_indices = @transform_14, window_bounds = array<i64: 2, 8, 32>}, {transform_indices = @transform_15, window_bounds = array<i64: 1, 2, 4, 8, 8>}]} {
    %c0_i32 = arith.constant 0 : i32
    %0 = arith.cmpi eq, %arg1, %c0_i32 : i32
    %1 = arith.extui %0 : i1 to i32
    %c0_i32_0 = arith.constant 0 : i32
    %2 = arith.cmpi ne, %1, %c0_i32_0 : i32
    scf.if %2 {
      %c0_78 = arith.constant 0 : index
      %c0_79 = arith.constant 0 : index
      %c0_80 = arith.constant 0 : index
      %177 = vector.load %arg2[%c0_78, %c0_79, %c0_80] : memref<2x8x32xf32, #tpu.memory_space<vmem>>, vector<2x8x32xf32>
      %c0_81 = arith.constant 0 : index
      %c0_82 = arith.constant 0 : index
      %c0_83 = arith.constant 0 : index
      %178 = vector.load %arg16[%c0_81, %c0_82, %c0_83] : memref<2x8x32xf32, #tpu.memory_space<vmem>>, vector<2x8x32xf32>
      tpu.vector_store %arg16[%c0_81, %c0_82, %c0_83], %177 {strides = array<i32>} : memref<2x8x32xf32, #tpu.memory_space<vmem>>, vector<2x8x32xf32>,
    } else {
    }
    %c0 = arith.constant 0 : index
    %c0_1 = arith.constant 0 : index
    %c0_2 = arith.constant 0 : index
    %3 = vector.load %arg16[%c0, %c0_1, %c0_2] : memref<2x8x32xf32, #tpu.memory_space<vmem>>, vector<2x8x32xf32>
    %4 = vector.shape_cast %3 : vector<2x8x32xf32> to vector<16x32xf32>
    %c0_3 = arith.constant 0 : index
    %c0_4 = arith.constant 0 : index
    %c0_5 = arith.constant 0 : index
    %5 = vector.load %arg4[%c0_3, %c0_4, %c0_5] : memref<1x32x768xf32, #tpu.memory_space<vmem>>, vector<1x32x768xf32>
    %6 = vector.shape_cast %5 : vector<1x32x768xf32> to vector<32x768xf32>
    %cst = arith.constant dense<0.000000e+00> : vector<16x768xf32>
    %7 = tpu.matmul %4, %6, %cst {dimension_numbers = #tpu.dot_dimension_numbers<[1], [0], [0], [1], [0, 0, 1, 1], [], []>} : vector<16x32xf32>, vector<32x768xf32>, vector<16x768xf32> -> vector<16x768xf32>
    %c0_6 = arith.constant 0 : index
    %c0_7 = arith.constant 0 : index
    %c0_8 = arith.constant 0 : index
    %8 = vector.load %arg5[%c0_6, %c0_7, %c0_8] : memref<1x1x768xf32, #tpu.memory_space<vmem>>, vector<1x1x768xf32>
    %9 = vector.shape_cast %8 : vector<1x1x768xf32> to vector<1x768xf32>
    %10 = vector.broadcast %9 : vector<1x768xf32> to vector<16x768xf32>
    %11 = arith.addf %7, %10 : vector<16x768xf32>
    %12 = vector.extract_strided_slice %11 {offsets = [0, 0], sizes = [16, 256], strides = [1, 1]} : vector<16x768xf32> to vector<16x256xf32>
    %13 = vector.extract_strided_slice %11 {offsets = [0, 256], sizes = [16, 256], strides = [1, 1]} : vector<16x768xf32> to vector<16x256xf32>
    %14 = vector.extract_strided_slice %11 {offsets = [0, 512], sizes = [16, 256], strides = [1, 1]} : vector<16x768xf32> to vector<16x256xf32>
    %15 = vector.extract_strided_slice %12 {offsets = [0, 0], sizes = [16, 64], strides = [1, 1]} : vector<16x256xf32> to vector<16x64xf32>
    %16 = vector.shape_cast %15 : vector<16x64xf32> to vector<2x8x64xf32>
    %17 = vector.extract_strided_slice %13 {offsets = [0, 0], sizes = [16, 64], strides = [1, 1]} : vector<16x256xf32> to vector<16x64xf32>
    %18 = vector.shape_cast %17 : vector<16x64xf32> to vector<2x8x64xf32>
    "tpu.trace_start"() <{level = 10 : i32, message = "bqd,bkd->bqk"}> : () -> ()
    %cst_9 = arith.constant dense<0.000000e+00> : vector<2x8x8xf32>
    %19 = tpu.matmul %16, %18, %cst_9 {dimension_numbers = #tpu.dot_dimension_numbers<[2], [2], [1], [1], [0, 0, 0, 1, 1, 1], [0], [0]>} : vector<2x8x64xf32>, vector<2x8x64xf32>, vector<2x8x8xf32> -> vector<2x8x8xf32>
    "tpu.trace_stop"() : () -> ()
    %20 = vector.extract_strided_slice %12 {offsets = [0, 64], sizes = [16, 64], strides = [1, 1]} : vector<16x256xf32> to vector<16x64xf32>
    %21 = vector.shape_cast %20 : vector<16x64xf32> to vector<2x8x64xf32>
    %22 = vector.extract_strided_slice %13 {offsets = [0, 64], sizes = [16, 64], strides = [1, 1]} : vector<16x256xf32> to vector<16x64xf32>
    %23 = vector.shape_cast %22 : vector<16x64xf32> to vector<2x8x64xf32>
    "tpu.trace_start"() <{level = 10 : i32, message = "bqd,bkd->bqk"}> : () -> ()
    %cst_10 = arith.constant dense<0.000000e+00> : vector<2x8x8xf32>
    %24 = tpu.matmul %21, %23, %cst_10 {dimension_numbers = #tpu.dot_dimension_numbers<[2], [2], [1], [1], [0, 0, 0, 1, 1, 1], [0], [0]>} : vector<2x8x64xf32>, vector<2x8x64xf32>, vector<2x8x8xf32> -> vector<2x8x8xf32>
    "tpu.trace_stop"() : () -> ()
    %25 = vector.extract_strided_slice %12 {offsets = [0, 128], sizes = [16, 64], strides = [1, 1]} : vector<16x256xf32> to vector<16x64xf32>
    %26 = vector.shape_cast %25 : vector<16x64xf32> to vector<2x8x64xf32>
    %27 = vector.extract_strided_slice %13 {offsets = [0, 128], sizes = [16, 64], strides = [1, 1]} : vector<16x256xf32> to vector<16x64xf32>
    %28 = vector.shape_cast %27 : vector<16x64xf32> to vector<2x8x64xf32>
    "tpu.trace_start"() <{level = 10 : i32, message = "bqd,bkd->bqk"}> : () -> ()
    %cst_11 = arith.constant dense<0.000000e+00> : vector<2x8x8xf32>
    %29 = tpu.matmul %26, %28, %cst_11 {dimension_numbers = #tpu.dot_dimension_numbers<[2], [2], [1], [1], [0, 0, 0, 1, 1, 1], [0], [0]>} : vector<2x8x64xf32>, vector<2x8x64xf32>, vector<2x8x8xf32> -> vector<2x8x8xf32>
    "tpu.trace_stop"() : () -> ()
    %30 = vector.extract_strided_slice %12 {offsets = [0, 192], sizes = [16, 64], strides = [1, 1]} : vector<16x256xf32> to vector<16x64xf32>
    %31 = vector.shape_cast %30 : vector<16x64xf32> to vector<2x8x64xf32>
    %32 = vector.extract_strided_slice %13 {offsets = [0, 192], sizes = [16, 64], strides = [1, 1]} : vector<16x256xf32> to vector<16x64xf32>
    %33 = vector.shape_cast %32 : vector<16x64xf32> to vector<2x8x64xf32>
    "tpu.trace_start"() <{level = 10 : i32, message = "bqd,bkd->bqk"}> : () -> ()
    %cst_12 = arith.constant dense<0.000000e+00> : vector<2x8x8xf32>
    %34 = tpu.matmul %31, %33, %cst_12 {dimension_numbers = #tpu.dot_dimension_numbers<[2], [2], [1], [1], [0, 0, 0, 1, 1, 1], [0], [0]>} : vector<2x8x64xf32>, vector<2x8x64xf32>, vector<2x8x8xf32> -> vector<2x8x8xf32>
    "tpu.trace_stop"() : () -> ()
    %35 = vector.shape_cast %19 : vector<2x8x8xf32> to vector<2x1x8x8xf32>
    %36 = vector.shape_cast %24 : vector<2x8x8xf32> to vector<2x1x8x8xf32>
    %37 = vector.shape_cast %29 : vector<2x8x8xf32> to vector<2x1x8x8xf32>
    %38 = vector.shape_cast %34 : vector<2x8x8xf32> to vector<2x1x8x8xf32>
    %39 = tpu.concatenate %35, %36, %37, %38 in 1 : vector<2x1x8x8xf32>, vector<2x1x8x8xf32>, vector<2x1x8x8xf32>, vector<2x1x8x8xf32> -> vector<2x4x8x8xf32>
    %c0_13 = arith.constant 0 : index
    %c0_14 = arith.constant 0 : index
    %40 = vector.load %arg3[%c0_13, %c0_14] : memref<2x8xf32, #tpu.memory_space<vmem>>, vector<2x8xf32>
    %41 = vector.shape_cast %40 : vector<2x8xf32> to vector<2x1x1x8xf32>
    %cst_15 = arith.constant 5.000000e-01 : f32
    %42 = vector.broadcast %cst_15 : f32 to vector<2x1x1x8xf32>
    %43 = arith.cmpf ogt, %41, %42 : vector<2x1x1x8xf32>
    %cst_16 = arith.constant -1.000000e+09 : f32
    %44 = vector.shape_cast %43 : vector<2x1x1x8xi1> to vector<2x1x1x8xi1>
    %45 = vector.broadcast %44 : vector<2x1x1x8xi1> to vector<2x4x8x8xi1>
    %46 = vector.broadcast %cst_16 : f32 to vector<2x4x8x8xf32>
    %47 = arith.select %45, %46, %39 : vector<2x4x8x8xi1>, vector<2x4x8x8xf32>
    %cst_17 = arith.constant dense<0xFF800000> : vector<2x4x8xf32>
    %48 = vector.multi_reduction <maximumf>, %47, %cst_17 [3] : vector<2x4x8x8xf32> to vector<2x4x8xf32>
    %49 = vector.shape_cast %48 : vector<2x4x8xf32> to vector<2x4x8x1xf32>
    %50 = vector.broadcast %49 : vector<2x4x8x1xf32> to vector<2x4x8x8xf32>
    %51 = arith.subf %47, %50 : vector<2x4x8x8xf32>
    %52 = math.exp %51 : vector<2x4x8x8xf32>
    %cst_18 = arith.constant dense<0.000000e+00> : vector<2x4x8xf32>
    %53 = vector.multi_reduction <add>, %52, %cst_18 [3] : vector<2x4x8x8xf32> to vector<2x4x8xf32>
    %54 = vector.shape_cast %53 : vector<2x4x8xf32> to vector<2x4x8x1xf32>
    %55 = tpu.reciprocal %54 {approx = true} : vector<2x4x8x1xf32> -> vector<2x4x8x1xf32>
    %56 = vector.broadcast %55 : vector<2x4x8x1xf32> to vector<2x4x8x8xf32>
    %57 = arith.mulf %52, %56 : vector<2x4x8x8xf32>
    %c0_19 = arith.constant 0 : index
    %c0_20 = arith.constant 0 : index
    %c0_21 = arith.constant 0 : index
    %c0_22 = arith.constant 0 : index
    %c0_23 = arith.constant 0 : index
    %58 = vector.load %arg17[%c0_19, %c0_20, %c0_21, %c0_22, %c0_23] : memref<1x2x4x8x8xf32, #tpu.memory_space<vmem>>, vector<1x2x4x8x8xf32>
    %59 = vector.shape_cast %58 : vector<1x2x4x8x8xf32> to vector<2x4x8x8xf32>
    %60 = vector.shape_cast %57 : vector<2x4x8x8xf32> to vector<1x2x4x8x8xf32>
    tpu.vector_store %arg17[%c0_19, %c0_20, %c0_21, %c0_22, %c0_23], %60 {strides = array<i32>} : memref<1x2x4x8x8xf32, #tpu.memory_space<vmem>>, vector<1x2x4x8x8xf32>,
    %61 = vector.extract_strided_slice %14 {offsets = [0, 0], sizes = [16, 64], strides = [1, 1]} : vector<16x256xf32> to vector<16x64xf32>
    %62 = vector.shape_cast %61 : vector<16x64xf32> to vector<2x8x64xf32>
    %63 = vector.extract_strided_slice %57 {offsets = [0, 0, 0, 0], sizes = [2, 1, 8, 8], strides = [1, 1, 1, 1]} : vector<2x4x8x8xf32> to vector<2x1x8x8xf32>
    %64 = vector.shape_cast %63 : vector<2x1x8x8xf32> to vector<2x8x8xf32>
    "tpu.trace_start"() <{level = 10 : i32, message = "bqk,bkd->bqd"}> : () -> ()
    %cst_24 = arith.constant dense<0.000000e+00> : vector<2x8x64xf32>
    %65 = tpu.matmul %64, %62, %cst_24 {dimension_numbers = #tpu.dot_dimension_numbers<[2], [1], [1], [2], [0, 0, 0, 1, 1, 2], [0], [0]>} : vector<2x8x8xf32>, vector<2x8x64xf32>, vector<2x8x64xf32> -> vector<2x8x64xf32>
    "tpu.trace_stop"() : () -> ()
    %66 = vector.extract_strided_slice %14 {offsets = [0, 64], sizes = [16, 64], strides = [1, 1]} : vector<16x256xf32> to vector<16x64xf32>
    %67 = vector.shape_cast %66 : vector<16x64xf32> to vector<2x8x64xf32>
    %68 = vector.extract_strided_slice %57 {offsets = [0, 1, 0, 0], sizes = [2, 1, 8, 8], strides = [1, 1, 1, 1]} : vector<2x4x8x8xf32> to vector<2x1x8x8xf32>
    %69 = vector.shape_cast %68 : vector<2x1x8x8xf32> to vector<2x8x8xf32>
    "tpu.trace_start"() <{level = 10 : i32, message = "bqk,bkd->bqd"}> : () -> ()
    %cst_25 = arith.constant dense<0.000000e+00> : vector<2x8x64xf32>
    %70 = tpu.matmul %69, %67, %cst_25 {dimension_numbers = #tpu.dot_dimension_numbers<[2], [1], [1], [2], [0, 0, 0, 1, 1, 2], [0], [0]>} : vector<2x8x8xf32>, vector<2x8x64xf32>, vector<2x8x64xf32> -> vector<2x8x64xf32>
    "tpu.trace_stop"() : () -> ()
    %71 = vector.extract_strided_slice %14 {offsets = [0, 128], sizes = [16, 64], strides = [1, 1]} : vector<16x256xf32> to vector<16x64xf32>
    %72 = vector.shape_cast %71 : vector<16x64xf32> to vector<2x8x64xf32>
    %73 = vector.extract_strided_slice %57 {offsets = [0, 2, 0, 0], sizes = [2, 1, 8, 8], strides = [1, 1, 1, 1]} : vector<2x4x8x8xf32> to vector<2x1x8x8xf32>
    %74 = vector.shape_cast %73 : vector<2x1x8x8xf32> to vector<2x8x8xf32>
    "tpu.trace_start"() <{level = 10 : i32, message = "bqk,bkd->bqd"}> : () -> ()
    %cst_26 = arith.constant dense<0.000000e+00> : vector<2x8x64xf32>
    %75 = tpu.matmul %74, %72, %cst_26 {dimension_numbers = #tpu.dot_dimension_numbers<[2], [1], [1], [2], [0, 0, 0, 1, 1, 2], [0], [0]>} : vector<2x8x8xf32>, vector<2x8x64xf32>, vector<2x8x64xf32> -> vector<2x8x64xf32>
    "tpu.trace_stop"() : () -> ()
    %76 = vector.extract_strided_slice %14 {offsets = [0, 192], sizes = [16, 64], strides = [1, 1]} : vector<16x256xf32> to vector<16x64xf32>
    %77 = vector.shape_cast %76 : vector<16x64xf32> to vector<2x8x64xf32>
    %78 = vector.extract_strided_slice %57 {offsets = [0, 3, 0, 0], sizes = [2, 1, 8, 8], strides = [1, 1, 1, 1]} : vector<2x4x8x8xf32> to vector<2x1x8x8xf32>
    %79 = vector.shape_cast %78 : vector<2x1x8x8xf32> to vector<2x8x8xf32>
    "tpu.trace_start"() <{level = 10 : i32, message = "bqk,bkd->bqd"}> : () -> ()
    %cst_27 = arith.constant dense<0.000000e+00> : vector<2x8x64xf32>
    %80 = tpu.matmul %79, %77, %cst_27 {dimension_numbers = #tpu.dot_dimension_numbers<[2], [1], [1], [2], [0, 0, 0, 1, 1, 2], [0], [0]>} : vector<2x8x8xf32>, vector<2x8x64xf32>, vector<2x8x64xf32> -> vector<2x8x64xf32>
    "tpu.trace_stop"() : () -> ()
    %81 = tpu.concatenate %65, %70, %75, %80 in 2 : vector<2x8x64xf32>, vector<2x8x64xf32>, vector<2x8x64xf32>, vector<2x8x64xf32> -> vector<2x8x256xf32>
    %82 = vector.shape_cast %81 : vector<2x8x256xf32> to vector<16x256xf32>
    %c0_28 = arith.constant 0 : index
    %c0_29 = arith.constant 0 : index
    %c0_30 = arith.constant 0 : index
    %83 = vector.load %arg6[%c0_28, %c0_29, %c0_30] : memref<1x256x32xf32, #tpu.memory_space<vmem>>, vector<1x256x32xf32>
    %84 = vector.shape_cast %83 : vector<1x256x32xf32> to vector<256x32xf32>
    %cst_31 = arith.constant dense<0.000000e+00> : vector<16x32xf32>
    %85 = tpu.matmul %82, %84, %cst_31 {dimension_numbers = #tpu.dot_dimension_numbers<[1], [0], [0], [1], [0, 0, 1, 1], [], []>} : vector<16x256xf32>, vector<256x32xf32>, vector<16x32xf32> -> vector<16x32xf32>
    %c0_32 = arith.constant 0 : index
    %c0_33 = arith.constant 0 : index
    %c0_34 = arith.constant 0 : index
    %86 = vector.load %arg7[%c0_32, %c0_33, %c0_34] : memref<1x1x32xf32, #tpu.memory_space<vmem>>, vector<1x1x32xf32>
    %87 = vector.shape_cast %86 : vector<1x1x32xf32> to vector<1x32xf32>
    %88 = vector.broadcast %87 : vector<1x32xf32> to vector<16x32xf32>
    %89 = arith.addf %85, %88 : vector<16x32xf32>
    %90 = arith.addf %4, %89 : vector<16x32xf32>
    %c0_35 = arith.constant 0 : index
    %c0_36 = arith.constant 0 : index
    %c0_37 = arith.constant 0 : index
    %91 = vector.load %arg8[%c0_35, %c0_36, %c0_37] : memref<1x1x32xf32, #tpu.memory_space<vmem>>, vector<1x1x32xf32>
    %92 = vector.shape_cast %91 : vector<1x1x32xf32> to vector<1x32xf32>
    %c0_38 = arith.constant 0 : index
    %c0_39 = arith.constant 0 : index
    %c0_40 = arith.constant 0 : index
    %93 = vector.load %arg9[%c0_38, %c0_39, %c0_40] : memref<1x1x32xf32, #tpu.memory_space<vmem>>, vector<1x1x32xf32>
    %94 = vector.shape_cast %93 : vector<1x1x32xf32> to vector<1x32xf32>
    %cst_41 = arith.constant dense<0.000000e+00> : vector<16xf32>
    %95 = vector.multi_reduction <add>, %90, %cst_41 [1] : vector<16x32xf32> to vector<16xf32>
    %96 = vector.shape_cast %95 : vector<16xf32> to vector<16x1xf32>
    %cst_42 = arith.constant 3.200000e+01 : f32
    %97 = vector.broadcast %cst_42 : f32 to vector<16x1xf32>
    %98 = arith.divf %96, %97 : vector<16x1xf32>
    %99 = vector.broadcast %98 : vector<16x1xf32> to vector<16x32xf32>
    %100 = arith.subf %90, %99 : vector<16x32xf32>
    %101 = vector.broadcast %98 : vector<16x1xf32> to vector<16x32xf32>
    %102 = arith.subf %90, %101 : vector<16x32xf32>
    %103 = arith.mulf %100, %102 : vector<16x32xf32>
    %cst_43 = arith.constant dense<0.000000e+00> : vector<16xf32>
    %104 = vector.multi_reduction <add>, %103, %cst_43 [1] : vector<16x32xf32> to vector<16xf32>
    %105 = vector.shape_cast %104 : vector<16xf32> to vector<16x1xf32>
    %cst_44 = arith.constant 3.200000e+01 : f32
    %106 = vector.broadcast %cst_44 : f32 to vector<16x1xf32>
    %107 = arith.divf %105, %106 : vector<16x1xf32>
    %108 = vector.broadcast %98 : vector<16x1xf32> to vector<16x32xf32>
    %109 = arith.subf %90, %108 : vector<16x32xf32>
    %cst_45 = arith.constant 9.99999996E-13 : f32
    %110 = vector.broadcast %cst_45 : f32 to vector<16x1xf32>
    %111 = arith.addf %107, %110 : vector<16x1xf32>
    %112 = math.rsqrt %111 : vector<16x1xf32>
    %113 = vector.broadcast %112 : vector<16x1xf32> to vector<16x32xf32>
    %114 = arith.mulf %109, %113 : vector<16x32xf32>
    %115 = vector.broadcast %92 : vector<1x32xf32> to vector<16x32xf32>
    %116 = arith.mulf %114, %115 : vector<16x32xf32>
    %117 = vector.broadcast %94 : vector<1x32xf32> to vector<16x32xf32>
    %118 = arith.addf %116, %117 : vector<16x32xf32>
    %c0_46 = arith.constant 0 : index
    %c0_47 = arith.constant 0 : index
    %c0_48 = arith.constant 0 : index
    %119 = vector.load %arg10[%c0_46, %c0_47, %c0_48] : memref<1x32x128xf32, #tpu.memory_space<vmem>>, vector<1x32x128xf32>
    %120 = vector.shape_cast %119 : vector<1x32x128xf32> to vector<32x128xf32>
    %cst_49 = arith.constant dense<0.000000e+00> : vector<16x128xf32>
    %121 = tpu.matmul %118, %120, %cst_49 {dimension_numbers = #tpu.dot_dimension_numbers<[1], [0], [0], [1], [0, 0, 1, 1], [], []>} : vector<16x32xf32>, vector<32x128xf32>, vector<16x128xf32> -> vector<16x128xf32>
    %c0_50 = arith.constant 0 : index
    %c0_51 = arith.constant 0 : index
    %c0_52 = arith.constant 0 : index
    %122 = vector.load %arg11[%c0_50, %c0_51, %c0_52] : memref<1x1x128xf32, #tpu.memory_space<vmem>>, vector<1x1x128xf32>
    %123 = vector.shape_cast %122 : vector<1x1x128xf32> to vector<1x128xf32>
    %124 = vector.broadcast %123 : vector<1x128xf32> to vector<16x128xf32>
    %125 = arith.addf %121, %124 : vector<16x128xf32>
    %cst_53 = arith.constant 5.000000e-01 : f32
    %126 = vector.broadcast %cst_53 : f32 to vector<16x128xf32>
    %127 = arith.mulf %126, %125 : vector<16x128xf32>
    %cst_54 = arith.constant 4.471500e-02 : f32
    %128 = vector.broadcast %cst_54 : f32 to vector<16x128xf32>
    %129 = arith.mulf %128, %125 : vector<16x128xf32>
    %130 = arith.mulf %129, %125 : vector<16x128xf32>
    %131 = arith.mulf %130, %125 : vector<16x128xf32>
    %132 = arith.addf %125, %131 : vector<16x128xf32>
    %cst_55 = arith.constant 0.797884583 : f32
    %133 = vector.broadcast %cst_55 : f32 to vector<16x128xf32>
    %134 = arith.mulf %133, %132 : vector<16x128xf32>
    %135 = math.tanh %134 : vector<16x128xf32>
    %cst_56 = arith.constant 1.000000e+00 : f32
    %136 = vector.broadcast %cst_56 : f32 to vector<16x128xf32>
    %137 = arith.addf %136, %135 : vector<16x128xf32>
    %138 = arith.mulf %127, %137 : vector<16x128xf32>
    %c0_57 = arith.constant 0 : index
    %c0_58 = arith.constant 0 : index
    %c0_59 = arith.constant 0 : index
    %139 = vector.load %arg12[%c0_57, %c0_58, %c0_59] : memref<1x128x32xf32, #tpu.memory_space<vmem>>, vector<1x128x32xf32>
    %140 = vector.shape_cast %139 : vector<1x128x32xf32> to vector<128x32xf32>
    %cst_60 = arith.constant dense<0.000000e+00> : vector<16x32xf32>
    %141 = tpu.matmul %138, %140, %cst_60 {dimension_numbers = #tpu.dot_dimension_numbers<[1], [0], [0], [1], [0, 0, 1, 1], [], []>} : vector<16x128xf32>, vector<128x32xf32>, vector<16x32xf32> -> vector<16x32xf32>
    %c0_61 = arith.constant 0 : index
    %c0_62 = arith.constant 0 : index
    %c0_63 = arith.constant 0 : index
    %142 = vector.load %arg13[%c0_61, %c0_62, %c0_63] : memref<1x1x32xf32, #tpu.memory_space<vmem>>, vector<1x1x32xf32>
    %143 = vector.shape_cast %142 : vector<1x1x32xf32> to vector<1x32xf32>
    %144 = vector.broadcast %143 : vector<1x32xf32> to vector<16x32xf32>
    %145 = arith.addf %141, %144 : vector<16x32xf32>
    %146 = arith.addf %145, %118 : vector<16x32xf32>
    %c0_64 = arith.constant 0 : index
    %c0_65 = arith.constant 0 : index
    %c0_66 = arith.constant 0 : index
    %147 = vector.load %arg14[%c0_64, %c0_65, %c0_66] : memref<1x1x32xf32, #tpu.memory_space<vmem>>, vector<1x1x32xf32>
    %148 = vector.shape_cast %147 : vector<1x1x32xf32> to vector<1x32xf32>
    %c0_67 = arith.constant 0 : index
    %c0_68 = arith.constant 0 : index
    %c0_69 = arith.constant 0 : index
    %149 = vector.load %arg15[%c0_67, %c0_68, %c0_69] : memref<1x1x32xf32, #tpu.memory_space<vmem>>, vector<1x1x32xf32>
    %150 = vector.shape_cast %149 : vector<1x1x32xf32> to vector<1x32xf32>
    %cst_70 = arith.constant dense<0.000000e+00> : vector<16xf32>
    %151 = vector.multi_reduction <add>, %146, %cst_70 [1] : vector<16x32xf32> to vector<16xf32>
    %152 = vector.shape_cast %151 : vector<16xf32> to vector<16x1xf32>
    %cst_71 = arith.constant 3.200000e+01 : f32
    %153 = vector.broadcast %cst_71 : f32 to vector<16x1xf32>
    %154 = arith.divf %152, %153 : vector<16x1xf32>
    %155 = vector.broadcast %154 : vector<16x1xf32> to vector<16x32xf32>
    %156 = arith.subf %146, %155 : vector<16x32xf32>
    %157 = vector.broadcast %154 : vector<16x1xf32> to vector<16x32xf32>
    %158 = arith.subf %146, %157 : vector<16x32xf32>
    %159 = arith.mulf %156, %158 : vector<16x32xf32>
    %cst_72 = arith.constant dense<0.000000e+00> : vector<16xf32>
    %160 = vector.multi_reduction <add>, %159, %cst_72 [1] : vector<16x32xf32> to vector<16xf32>
    %161 = vector.shape_cast %160 : vector<16xf32> to vector<16x1xf32>
    %cst_73 = arith.constant 3.200000e+01 : f32
    %162 = vector.broadcast %cst_73 : f32 to vector<16x1xf32>
    %163 = arith.divf %161, %162 : vector<16x1xf32>
    %164 = vector.broadcast %154 : vector<16x1xf32> to vector<16x32xf32>
    %165 = arith.subf %146, %164 : vector<16x32xf32>
    %cst_74 = arith.constant 9.99999996E-13 : f32
    %166 = vector.broadcast %cst_74 : f32 to vector<16x1xf32>
    %167 = arith.addf %163, %166 : vector<16x1xf32>
    %168 = math.rsqrt %167 : vector<16x1xf32>
    %169 = vector.broadcast %168 : vector<16x1xf32> to vector<16x32xf32>
    %170 = arith.mulf %165, %169 : vector<16x32xf32>
    %171 = vector.broadcast %148 : vector<1x32xf32> to vector<16x32xf32>
    %172 = arith.mulf %170, %171 : vector<16x32xf32>
    %173 = vector.broadcast %150 : vector<1x32xf32> to vector<16x32xf32>
    %174 = arith.addf %172, %173 : vector<16x32xf32>
    %175 = vector.shape_cast %174 : vector<16x32xf32> to vector<2x8x32xf32>
    %c0_75 = arith.constant 0 : index
    %c0_76 = arith.constant 0 : index
    %c0_77 = arith.constant 0 : index
    %176 = vector.load %arg16[%c0_75, %c0_76, %c0_77] : memref<2x8x32xf32, #tpu.memory_space<vmem>>, vector<2x8x32xf32>
    tpu.vector_store %arg16[%c0_75, %c0_76, %c0_77], %175 {strides = array<i32>} : memref<2x8x32xf32, #tpu.memory_space<vmem>>, vector<2x8x32xf32>,
    return
  }
  func.func @transform_0(%arg0: i32, %arg1: i32) -> (i32, i32, i32) {
    %c0_i32 = arith.constant 0 : i32
    %c0_i32_0 = arith.constant 0 : i32
    %c0_i32_1 = arith.constant 0 : i32
    return %arg0, %c0_i32, %c0_i32_0 : i32, i32, i32
  }
  func.func @transform_1(%arg0: i32, %arg1: i32) -> (i32, i32) {
    %c0_i32 = arith.constant 0 : i32
    %c0_i32_0 = arith.constant 0 : i32
    return %arg0, %c0_i32 : i32, i32
  }
  func.func @transform_2(%arg0: i32, %arg1: i32) -> (i32, i32, i32) {
    %c0_i32 = arith.constant 0 : i32
    %c0_i32_0 = arith.constant 0 : i32
    %c0_i32_1 = arith.constant 0 : i32
    return %arg1, %c0_i32, %c0_i32_0 : i32, i32, i32
  }
  func.func @transform_3(%arg0: i32, %arg1: i32) -> (i32, i32, i32) {
    %c0_i32 = arith.constant 0 : i32
    %c0_i32_0 = arith.constant 0 : i32
    %c0_i32_1 = arith.constant 0 : i32
    return %arg1, %c0_i32, %c0_i32_0 : i32, i32, i32
  }
  func.func @transform_4(%arg0: i32, %arg1: i32) -> (i32, i32, i32) {
    %c0_i32 = arith.constant 0 : i32
    %c0_i32_0 = arith.constant 0 : i32
    %c0_i32_1 = arith.constant 0 : i32
    return %arg1, %c0_i32, %c0_i32_0 : i32, i32, i32
  }
  func.func @transform_5(%arg0: i32, %arg1: i32) -> (i32, i32, i32) {
    %c0_i32 = arith.constant 0 : i32
    %c0_i32_0 = arith.constant 0 : i32
    %c0_i32_1 = arith.constant 0 : i32
    return %arg1, %c0_i32, %c0_i32_0 : i32, i32, i32
  }
  func.func @transform_6(%arg0: i32, %arg1: i32) -> (i32, i32, i32) {
    %c0_i32 = arith.constant 0 : i32
    %c0_i32_0 = arith.constant 0 : i32
    %c0_i32_1 = arith.constant 0 : i32
    return %arg1, %c0_i32, %c0_i32_0 : i32, i32, i32
  }
  func.func @transform_7(%arg0: i32, %arg1: i32) -> (i32, i32, i32) {
    %c0_i32 = arith.constant 0 : i32
    %c0_i32_0 = arith.constant 0 : i32
    %c0_i32_1 = arith.constant 0 : i32
    return %arg1, %c0_i32, %c0_i32_0 : i32, i32, i32
  }
  func.func @transform_8(%arg0: i32, %arg1: i32) -> (i32, i32, i32) {
    %c0_i32 = arith.constant 0 : i32
    %c0_i32_0 = arith.constant 0 : i32
    %c0_i32_1 = arith.constant 0 : i32
    return %arg1, %c0_i32, %c0_i32_0 : i32, i32, i32
  }
  func.func @transform_9(%arg0: i32, %arg1: i32) -> (i32, i32, i32) {
    %c0_i32 = arith.constant 0 : i32
    %c0_i32_0 = arith.constant 0 : i32
    %c0_i32_1 = arith.constant 0 : i32
    return %arg1, %c0_i32, %c0_i32_0 : i32, i32, i32
  }
  func.func @transform_10(%arg0: i32, %arg1: i32) -> (i32, i32, i32) {
    %c0_i32 = arith.constant 0 : i32
    %c0_i32_0 = arith.constant 0 : i32
    %c0_i32_1 = arith.constant 0 : i32
    return %arg1, %c0_i32, %c0_i32_0 : i32, i32, i32
  }
  func.func @transform_11(%arg0: i32, %arg1: i32) -> (i32, i32, i32) {
    %c0_i32 = arith.constant 0 : i32
    %c0_i32_0 = arith.constant 0 : i32
    %c0_i32_1 = arith.constant 0 : i32
    return %arg1, %c0_i32, %c0_i32_0 : i32, i32, i32
  }
  func.func @transform_12(%arg0: i32, %arg1: i32) -> (i32, i32, i32) {
    %c0_i32 = arith.constant 0 : i32
    %c0_i32_0 = arith.constant 0 : i32
    %c0_i32_1 = arith.constant 0 : i32
    return %arg1, %c0_i32, %c0_i32_0 : i32, i32, i32
  }
  func.func @transform_13(%arg0: i32, %arg1: i32) -> (i32, i32, i32) {
    %c0_i32 = arith.constant 0 : i32
    %c0_i32_0 = arith.constant 0 : i32
    %c0_i32_1 = arith.constant 0 : i32
    return %arg1, %c0_i32, %c0_i32_0 : i32, i32, i32
  }
  func.func @transform_14(%arg0: i32, %arg1: i32) -> (i32, i32, i32) {
    %c0_i32 = arith.constant 0 : i32
    %c0_i32_0 = arith.constant 0 : i32
    %c0_i32_1 = arith.constant 0 : i32
    return %arg0, %c0_i32, %c0_i32_0 : i32, i32, i32
  }
  func.func @transform_15(%arg0: i32, %arg1: i32) -> (i32, i32, i32, i32, i32) {
    %c0_i32 = arith.constant 0 : i32
    %c0_i32_0 = arith.constant 0 : i32
    %c0_i32_1 = arith.constant 0 : i32
    %c0_i32_2 = arith.constant 0 : i32
    return %arg1, %arg0, %c0_i32, %c0_i32_0, %c0_i32_1 : i32, i32, i32, i32, i32
  }
}

</mosaic_0001>

<bundles_post_ra>
// kernel: tpu_custom_call.1
= control target key start
LH: loop header
LB: loop body
LE: loop exit
PB: predicated region body
PF: predicated region fallthrough
CT: control target
= control target key end

     0   :  { %s4273_s0 = inlined_call_operand.vmem [shape: f32[2,8,32], index: 0, kind: input, shape index: {}]   ;;  %s4274_s1 = inlined_call_operand.vmem [shape: f32[2,8], index: 1, kind: input, shape index: {}]   ;;  %s4275_s2 = inlined_call_operand.vmem [shape: f32[2,32,768], index: 2, kind: input, shape index: {}]   ;;  %s4276_s3 = inlined_call_operand.vmem [shape: f32[2,1,768], index: 3, kind: input, shape index: {}]   ;;  %s4277_s4 = inlined_call_operand.vmem [shape: f32[2,256,32], index: 4, kind: input, shape index: {}]   ;;  %s4278_s5 = inlined_call_operand.vmem [shape: f32[2,1,32], index: 5, kind: input, shape index: {}]   ;;  %s4279_s6 = inlined_call_operand.vmem [shape: f32[2,1,32], index: 6, kind: input, shape index: {}]   ;;  %s4280_s7 = inlined_call_operand.vmem [shape: f32[2,1,32], index: 7, kind: input, shape index: {}]   ;;  %s4281_s8 = inlined_call_operand.vmem [shape: f32[2,32,128], index: 8, kind: input, shape index: {}]   ;;  %s4282_s9 = inlined_call_operand.vmem [shape: f32[2,1,128], index: 9, kind: input, shape index: {}]   ;;  %s4283_s10 = inlined_call_operand.vmem [shape: f32[2,128,32], index: 10, kind: input, shape index: {}]   ;;  %s4284_s11 = inlined_call_operand.vmem [shape: f32[2,1,32], index: 11, kind: input, shape index: {}]   ;;  %s4285_s12 = inlined_call_operand.vmem [shape: f32[2,1,32], index: 12, kind: input, shape index: {}]   ;;  %s4286_s13 = inlined_call_operand.vmem [shape: f32[2,1,32], index: 13, kind: input, shape index: {}]   ;;  %s4287_s14 = inlined_call_operand.hbm [shape: f32[2,8,32], index: 14, kind: output, shape index: {0}]   ;;  %s4288_s15 = inlined_call_operand.hbm [shape: f32[2,2,4,8,8], index: 15, kind: output, shape index: {1}]  }
   0x1   :  { %4305 = sst [smem:[#allocation19_spill]] %s4273_s0 }
   0x2   :  { %4306 = sst [smem:[#allocation20_spill]] %s4274_s1 }
   0x3   :  { %4307 = sst [smem:[#allocation21_spill]] %s4275_s2 }
   0x4   :  { %4308 = sst [smem:[#allocation22_spill]] %s4276_s3 }
   0x5   :  { %4309 = sst [smem:[#allocation23_spill]] %s4277_s4 }
   0x6   :  { %4310 = sst [smem:[#allocation24_spill]] %s4287_s14 }
   0x7   :  { %4311 = sst [smem:[#allocation25_spill]] %s4288_s15 }
   0x8   :  { %21 = vsyncpa [#allocation3], 0 }
   0x9   :  { %22 = vsyncpa [#allocation5], 0 }
   0xa   :  { %24 = vsyncpa [#allocation5 + $0x1], 0  ;;  %s3700_s18 = smov 0   ;;  %s3702_s19 = smov 0  }
   0xb   :  { %s3704_s20 = smov 0   ;;  %s3706_s21 = smov 0  }
   0xc   :  { %s3708_s22 = smov 0   ;;  %s3710_s23 = smov 0  }
   0xd LB: > { %4312 = sst [smem:[#allocation8_spill]] %s3589_s18  ;;  %s3093_s24 = sadd.s32 4294967295, %s3609_s23   ;;  %s3609_s23 = sphi %s3710_s23, %s30_s23   ;;  %s3605_s22 = sphi %s3708_s22, %s4355_s22   ;;  %s3601_s21 = sphi %s3706_s21, %s4354_s21   ;;  %s3597_s20 = sphi %s3704_s20, %s4353_s20   ;;  %s3593_s19 = sphi %s3702_s19, %s4352_s19   ;;  %s3589_s18 = sphi %s3700_s18, %s4351_s18  }
   0xe   : > { %4313 = sst [smem:[#allocation9_spill]] %s3593_s19  ;;  %s3094_s25 = sadd.s32 4294967294, %s3609_s23  }
   0xf   : > { %4314 = sst [smem:[#allocation10_spill]] %s3597_s20  ;;  %s39_s26 = sadd.s32 1, %s3605_s22 }
  0x10   : > { %4315 = sst [smem:[#allocation11_spill]] %s3601_s21  ;;  %s441_s27 = sadd.s32 1, %s3597_s20 }
  0x11   : > { %4316 = sst [smem:[#allocation12_spill]] %s3605_s22  ;;  %p40_p0 = scmp.ge.s32.totalorder %s39_s26, 2 }
  0x12   : > { %4317 = sst [smem:[#allocation13_spill]] %s3609_s23  ;;  %p451_p1 = scmp.ne.s32.totalorder %s3597_s20, %s3593_s19 }
  0x13   : > { %p3736_p2 = scmp.eq.s32.totalorder %s3093_s24, 1  ;;  %p457_p3 = scmp.ne.s32.totalorder %s3593_s19, %s3589_s18 }
  0x14   : > { %s4357_s26 = smov (%p40_p0, %s39_s26), 0  ;;  %p458_p5 = scmp.eq.s32.totalorder %s3094_s25, 1 }
  0x15   : > { %s4318_s28 = scalar_select %p3736_p2, 1, 0 }
  0x16   : > { %4320 = sst [smem:[#allocation15_spill]] %s4357_s26  ;;  %p3746_p4 = por %p3736_p2, %p451_p1 }
  0x17   : > { %4319 = sst [smem:[#allocation14_spill]] %s4318_s28  ;;  %s436_s30 = ssub.s32 %s3605_s22, %s4357_s26 }
  0x18   : > { %s4321_s29 = scalar_select %p3746_p4, 1, 0 }
  0x19   : > { %p3099_p6 = scmp.ge.s32.totalorder %s3609_s23, 1  ;;  %p439_p7 = scmp.eq.s32.totalorder %s436_s30, 0 }
  0x1a   : > { %4322 = sst [smem:[#allocation16_spill]] %s4321_s29  ;;  %p3753_p8 = por %p458_p5, %p457_p3 }
  0x1b   : > { %p573_p9 = scmp.lt.s32.totalorder %s3609_s23, 3 }
  0x1c   : > { %s4323_s16 = scalar_select %p3753_p8, 1, 0 }
  0x1d   : > { %s3759_s17 = scalar_select %p439_p7, %s3597_s20, %s441_s27  }
  0x1e   : > { %4324 = sst [smem:[#allocation17_spill]] %s4323_s16  ;;  %p574_p10 = pnand %p3099_p6, %p573_p9 }
  0x1f   : > { %4325 = sst [smem:[#allocation18_spill]] %s3759_s17  ;;  %s4292_s24 = sand.u32 (!%p574_p10), 1, %s3593_s19  }
  0x20   : > { %577 = sbr.rel (%p574_p10) target bundleno = 2463 (0x99f), region = 76  ;;  %p680_p11 = scmp.lt.s32.totalorder (!%p574_p10), %s3601_s21, 1 }
  0x21   : > { %s3100_s25 = sshll.u32 (!%p574_p10), %s4292_s24, 6  ;;  %s4326_s4 = sld [smem:[#allocation23_spill]] (!%p574_p10) }
  0x22   : > { %s4327_s2 = sld [smem:[#allocation21_spill]] (!%p574_p10)  ;;  %s3826_s14 = scalar_lea.vmem (!%p574_p10), [#allocation4], %s3100_s25 }
  0x23   : > { %s4328_s3 = sld [smem:[#allocation22_spill]] (!%p574_p10) }
  0x24   : > { %s4329_s28 = sld [smem:[#allocation11_spill]] (!%p574_p10) }
  0x25   : > { %s3766_s26 = scalar_select %p680_p11, %s3601_s21, 1 }
  0x27   : > { %s3380_s27 = smul.u32 192, %s3766_s26  ;;  %s3156_s30 = sshll.u32 %s3766_s26, 8 }
  0x28   : > { %s3381_s22 = smul.u32 6, %s3766_s26  ;;  %s3774_s24 = scalar_lea.vmem %s4326_s4, %s3156_s30 }
  0x29   : > { %s3779_s23 = scalar_lea.vmem %s4327_s2, %s3380_s27  ;;  %s3157_s18 = sshll.u32 %s3766_s26, 5 }
  0x2a   : > { %s3788_s1 = scalar_lea.vmem %s4328_s3, %s3381_s22  ;;  %s3802_s2 = scalar_lea.vmem %s4281_s8, %s3157_s18 }
  0x2b   : > { %s710_s19 = scalar_lea.vmem %s4282_s9, %s3766_s26  ;;  %s3158_s22 = sshll.u32 %s3766_s26, 7 }
  0x2c   : > { %s3816_s17 = scalar_lea.vmem %s4283_s10, %s3158_s22  ;;  %s721_s16 = scalar_lea.vmem %s4285_s12, %s3766_s26 }
  0x2d   : > { %s724_s3 = scalar_lea.vmem %s4286_s13, %s3766_s26  ;;  %p3108_p12 = scmp.ne.s32.totalorder %s4329_s28, 0 }
  0x2e   : > { %s4330_s0 = sld [smem:[#allocation19_spill]] (!%p3108_p12) }
  0x2f   : > { %730 = sbr.rel (%p3108_p12) target bundleno = 54 (0x36), region = 80 }
  0x34   : > { %v731_v0 = vld [vmem:[%s4330_s0] sm:$0xff]  ;;  %vm733_vm0 = vcmask 261120   ;;  %v732_v1 = vld [vmem:[%s4330_s0 + $0x8] sm:$0xff] }
  0x35   : > { %734 = vst.msk [vmem:[#allocation2] sm:$0xff] %vm733_vm0, %v731_v0  ;;  %735 = vst.msk [vmem:[#allocation2 + $0x8] sm:$0xff] %vm733_vm0, %v732_v1 }
  0x36 PF: > { %v759_v2 = vld [vmem:[%s3779_s23 + $0xa8] sm:$0xff]  ;;  %v758_v3 = vld [vmem:[%s3779_s23 + $0xa0] sm:$0xff]  ;;  %v753_v4 = vld [vmem:[%s3779_s23 + $0x78] sm:$0xff]  ;;  %v3611_v8 = vmov 0.0   ;;  %vm794_vm1 = vcmask 261120   ;;  %vm3612_vm2 = vmmov 0   ;;  %v764_v29 = vlaneseq  ;;  %s4336_s30 = scalar_lea.vmem %s4278_s5, %s3766_s26  ;;  %s4337_s28 = scalar_lea.vmem %s4279_s6, %s3766_s26 }
  0x37   : > { %902 = vmatprep.subr.mxu1 %v759_v2  ;;  %v757_v5 = vld [vmem:[%s3779_s23 + $0x98] sm:$0xff]  ;;  %v752_v6 = vld [vmem:[%s3779_s23 + $0x70] sm:$0xff]  ;;  %942 = vmatprep.mubr.f32.mxu1 %v3611_v8  ;;  %v747_v9 = vld [vmem:[%s3779_s23 + $0x48] sm:$0xff]  ;;  %vm1032_vm3 = vcmask 523264   ;;  %s3613_s4 = smov 64   ;;  %s4331_s25 = sld [smem:[#allocation20_spill]] }
  0x38   : > { %v756_v7 = vld [vmem:[%s3779_s23 + $0x90] sm:$0xff]  ;;  %903 = vmatpush1.msra.mxu1 %v758_v3  ;;  %825 = vmatprep.subr.mxu0 %v757_v5  ;;  %v751_v10 = vld [vmem:[%s3779_s23 + $0x68] sm:$0xff]  ;;  %v746_v11 = vld [vmem:[%s3779_s23 + $0x40] sm:$0xff]  ;;  %v3887_v30 = vshrl.u32 %v764_v29, 7  ;;  %vm1697_vm7 = vcmask 64512   ;;  %s4338_s29 = scalar_lea.vmem %s4280_s7, %s3766_s26  ;;  %s4343_s18 = sld [smem:[#allocation25_spill]] }
  0x39   : > { %904 = vmatprep.subr.mxu1 %v753_v4  ;;  %826 = vmatpush1.msra.mxu0 %v756_v7  ;;  %v750_v12 = vld [vmem:[%s3779_s23 + $0x60] sm:$0xff]  ;;  %v745_v13 = vld [vmem:[%s3779_s23 + $0x38] sm:$0xff]  ;;  %v744_v15 = vld [vmem:[%s3779_s23 + $0x30] sm:$0xff]  ;;  %v3614_v7 = vmov 1966171168   ;;  %s3616_s22 = smov [#allocation4]  }
  0x3a   : > { %905 = vmatpush1.msra.mxu1 %v752_v6  ;;  %827 = vmatprep.subr.mxu0 %v751_v10  ;;  %v741_v14 = vld [vmem:[%s3779_s23 + $0x18] sm:$0xff]  ;;  %v740_v16 = vld [vmem:[%s3779_s23 + $0x10] sm:$0xff]  ;;  %v739_v17 = vld [vmem:[%s3779_s23 + $0x8] sm:$0xff]  ;;  %v774_v31 = vsub.s32 2, %v3887_v30  ;;  %v3894_v33 = vsub.s32 0, %v3887_v30  ;;  %v778_v38 = vsub.s32 3, %v3887_v30 }
  0x3b   : > { %906 = vmatprep.subr.mxu1 %v747_v9  ;;  %828 = vmatpush1.msra.mxu0 %v750_v12  ;;  %v738_v19 = vld [vmem:[%s3779_s23] sm:$0xff]  ;;  %v761_v21 = vld [vmem:[%s3779_s23 + $0xb8] sm:$0xff]  ;;  %v760_v22 = vld [vmem:[%s3779_s23 + $0xb0] sm:$0xff]  ;;  %v770_v45 = vsub.s32 1, %v3887_v30  ;;  %v782_v57 = vsub.s32 4, %v3887_v30  ;;  %v1660_v9 = vunpack.c.l.s4 %v3614_v7 }
  0x3c   : > { %907 = vmatpush1.msra.mxu1 %v746_v11  ;;  %829 = vmatprep.subr.mxu0 %v745_v13  ;;  %v3851_v18 = vld [vmem:[#allocation2] sm:$0xff]  ;;  %v3858_v20 = vld [vmem:[#allocation2 + $0x8] sm:$0xff]  ;;  %v749_v25 = vld [vmem:[%s3779_s23 + $0x58] sm:$0xff] }
  0x3d   : > { %908 = vmatprep.subr.mxu1 %v741_v14  ;;  %830 = vmatpush1.msra.mxu0 %v744_v15  ;;  %v755_v23 = vld [vmem:[%s3779_s23 + $0x88] sm:$0xff]  ;;  %v754_v24 = vld [vmem:[%s3779_s23 + $0x80] sm:$0xff]  ;;  %v748_v26 = vld [vmem:[%s3779_s23 + $0x50] sm:$0xff]  ;;  %v1661_v10 = vunpack.c.0.s8 %v1660_v9 }
  0x3e   : > { %909 = vmatpush1.msra.mxu1 %v740_v16  ;;  %831 = vmatprep.subr.mxu0 %v739_v17  ;;  %v743_v27 = vld [vmem:[%s3779_s23 + $0x28] sm:$0xff]  ;;  %v742_v28 = vld [vmem:[%s3779_s23 + $0x20] sm:$0xff]  ;;  %v3615_v16 = vmov 0   ;;  %s4341_s23 = sld [smem:[#allocation9_spill]]  ;;  %s4344_s27 = smov %s4343_s18 }
  0x3f   : > { %3111 = vmatmul.mubr.msk.f32.vlgmr.msra.gmra.mxu1 %vm794_vm1, %v3851_v18  ;;  %832 = vmatpush1.msra.mxu0 %v738_v19  ;;  %v3891_v32 = vld [vmem:[%s3788_s1] sm:$0x3f]  ;;  %v1664_v11 = vsub.s32 %v1661_v10, %v3887_v30  ;;  %s4340_s1 = sld [smem:[#allocation11_spill]] }
  0x40   : > { %865 = vmatprep.mubr.f32.mxu0 %v3611_v8  ;;  %948 = vmatprep.mubr.f32.mxu1 %v3611_v8  ;;  %v775_v34 = vrot.slane %v3891_v32, %v774_v31  ;;  %v767_v35 = vrot.slane %v3891_v32, %v3894_v33  ;;  %v779_v46 = vrot.slane %v3891_v32, %v778_v38  ;;  %v3131_v12 = vld.sshfl [vmem:[%s4331_s25] sm:$0x11 pattern:$0x75316420] }
  0x41   : > { %3109 = vmatmul.mubr.msk.f32.vlgmr.msra.gmra.mxu0 %vm794_vm1, %v3851_v18  ;;  %3254 = vmatprep.subr.mxu1 %v3611_v8  ;;  %v771_v49 = vrot.slane %v3891_v32, %v770_v45  ;;  %v783_v61 = vrot.slane %v3891_v32, %v782_v57  ;;  %v1665_v13 = vrot.slane %v3131_v12, %v1664_v11 }
  0x42   : > { %871 = vmatprep.mubr.f32.mxu0 %v3611_v8  ;;  %979 = vmatprep.subr.mxu0 %v761_v21  ;;  %v1658_v14 = vcombine.high %v3131_v12, %v3131_v12 }
  0x43   : > { %3112 = vmatmul.mubr.msk.f32.gmra.mxu1 %vm794_vm1, %v3858_v20  ;;  %980 = vmatpush1.msra.mxu0 %v760_v22  ;;  %vm1675_vm4 = vcmp.gt.f32.partialorder %v1665_v13, 0.5 }
  0x44   : > { %3256 = vmatprep.mubr.msk.f32.mxu1 %vm3612_vm2, %v3611_v8  ;;  %981 = vmatprep.subr.mxu0 %v755_v23  ;;  %v1672_v15 = vrot.slane %v1658_v14, %v1664_v11  ;;  %v1677_v17 = vsel %vm1675_vm4, 1, %v3615_v16  ;;  %s4345_s15 = sand.u32 1, %s4341_s23  }
  0x45   : > { %3110 = vmatmul.mubr.msk.f32.gmra.mxu0 %vm794_vm1, %v3858_v20  ;;  %v1682_v19 = vrot.slane %v1677_v17, %v3894_v33 }
  0x46   : > { %1019 = vmatprep.mubr.f32.mxu0 %v3611_v8  ;;  %982 = vmatpush1.msra.mxu0 %v754_v24  ;;  %vm1676_vm5 = vcmp.gt.f32.partialorder %v1672_v15, 0.5 }
  0x47   : > { %983 = vmatprep.subr.mxu0 %v749_v25  ;;  %v1678_v21 = vsel %vm1676_vm5, 1, %v3615_v16  ;;  %vm3968_vm6 = vcmp.eq.s32.totalorder %v1682_v19, 1 }
  0x48   : > { %984 = vmatpush1.msra.mxu0 %v748_v26  ;;  %v1686_v23 = vrot.slane %v1678_v21, %v3894_v33 }
  0x49   : > { %985 = vmatprep.subr.mxu0 %v743_v27 }
  0x4a   : > { %986 = vmatpush1.msra.mxu0 %v742_v28  ;;  %vm3976_vm8 = vcmp.eq.s32.totalorder %v1686_v23, 1 }
  0x4b   : > { %3113 = vmatmul.mubr.msk.f32.vlgmr.msra.gmra.mxu0 %vm794_vm1, %v3851_v18  ;;  %3264 = vmatprep.subr.mxu0 %v3611_v8 }
  0x4c   : > { %1025 = vmatprep.mubr.f32.mxu0 %v3611_v8 }
  0x4f   : > { %3114 = vmatmul.mubr.msk.f32.gmra.mxu0 %vm794_vm1, %v3858_v20 }
  0x50   : > { %3266 = vmatprep.mubr.msk.f32.mxu0 %vm3612_vm2, %v3611_v8 }
  0xff   : > { %v944_v36 = vpop.f32.mrf.mxu1 }
 0x100   : > { %v945_v37 = vadd.f32 %v944_v36, %v775_v34 }
 0x101   : > { %v946_v39 = vpop.f32.mrf.mxu1  ;;  %v867_v40 = vpop.f32.mrf.mxu0 }
 0x102   : > { %1187 = vrot.lane.b32.xlu0 %v945_v37, %s3613_s4  ;;  %v868_v41 = vadd.f32 %v867_v40, %v767_v35  ;;  %3255 = vmatpush3.xpose.msk.msra.mxu1 %vm1032_vm3, %v945_v37  ;;  %v947_v50 = vadd.f32 %v946_v39, %v779_v46 }
 0x103   : > { %v950_v42 = vpop.f32.mrf.mxu1  ;;  %v869_v43 = vpop.f32.mrf.mxu0  ;;  %3259 = vmatprep.subr.mxu1 %v3611_v8 }
 0x104   : > { %v951_v44 = vadd.f32 %v950_v42, %v775_v34  ;;  %v870_v52 = vadd.f32 %v869_v43, %v771_v49 }
 0x105   : > { %3257 = vmatmul.mubr.msk.f32.vlgmr.msra.gmra.mxu1 %vm1032_vm3, %v868_v41  ;;  %v873_v47 = vpop.f32.mrf.mxu0  ;;  %v952_v51 = vpop.f32.mrf.mxu1 }
 0x106   : > { %1265 = vrot.lane.b32.xlu1 %v951_v44, %s3613_s4  ;;  %v874_v48 = vadd.f32 %v873_v47, %v767_v35  ;;  %1185 = vrot.lane.b32.xlu0 %v868_v41, %s3613_s4  ;;  %v953_v53 = vadd.f32 %v952_v51, %v779_v46 }
 0x107   : > { %3260 = vmatpush3.xpose.msk.msra.mxu1 %vm1032_vm3, %v951_v44  ;;  %3261 = vmatprep.mubr.msk.f32.mxu1 %vm3612_vm2, %v3611_v8  ;;  %v875_v54 = vpop.f32.mrf.mxu0 }
 0x108   : > { %3269 = vmatprep.subr.mxu1 %v3611_v8  ;;  %v876_v55 = vadd.f32 %v875_v54, %v771_v49 }
 0x10a   : > { %3262 = vmatmul.mubr.msk.f32.vlgmr.msra.gmra.mxu1 %vm1032_vm3, %v874_v48  ;;  %1263 = vrot.lane.b32.xlu1 %v874_v48, %s3613_s4 }
 0x10b   : > { %1495 = vrot.lane.b32.xlu0 %v947_v50, %s3613_s4  ;;  %3271 = vmatprep.mubr.msk.f32.mxu1 %vm3612_vm2, %v3611_v8  ;;  %v1021_v60 = vpop.f32.mrf.mxu0 }
 0x10c   : > { %v3942_v1 = vadd.f32 %v1021_v60, %v783_v61 }
 0x10d   : > { %v3934_v0 = vpop.f32.mrf.mxu0 }
 0x10e   : > { %1493 = vrot.lane.b32.xlu1 %v870_v52, %s3613_s4 }
 0x10f   : > { %1573 = vrot.lane.b32.xlu0 %v953_v53, %s3613_s4  ;;  %v1027_v4 = vpop.f32.mrf.mxu0 }
 0x110   : > { %v3951_v5 = vadd.f32 %v1027_v4, %v783_v61 }
 0x111   : > { %v3983_v33 = vpop.f32.mrf.mxu0 }
 0x112   : > { %1571 = vrot.lane.b32.xlu1 %v876_v55, %s3613_s4 }
 0x174   : > { %v1188_v56 = vpop.permute.xlu0 %1187 }
 0x175   : > { %3265 = vmatpush3.xpose.msk.msra.mxu0 %vm1032_vm3, %v1188_v56 }
 0x176   : > { %3274 = vmatprep.subr.mxu0 %v3611_v8 }
 0x178   : > { %v1266_v58 = vpop.permute.xlu1 %1265  ;;  %v1186_v59 = vpop.permute.xlu0 %1185 }
 0x179   : > { %3267 = vmatmul.mubr.msk.f32.vlgmr.msra.gmra.mxu0 %vm1032_vm3, %v1186_v59  ;;  %3270 = vmatpush3.xpose.msk.msra.mxu1 %vm1032_vm3, %v1266_v58 }
 0x17a   : > { %3275 = vmatpush3.xpose.msk.msra.mxu0 %vm1032_vm3, %v947_v50  ;;  %3276 = vmatprep.mubr.msk.f32.mxu0 %vm3612_vm2, %v3611_v8 }
 0x17b   : > { %3284 = vmatprep.subr.mxu0 %v3611_v8  ;;  %3279 = vmatprep.subr.mxu1 %v3611_v8 }
 0x17c   : > { %v1264_v62 = vpop.permute.xlu1 %1263 }
 0x17d   : > { %v1496_v63 = vpop.permute.xlu0 %1495  ;;  %3272 = vmatmul.mubr.msk.f32.vlgmr.msra.gmra.mxu1 %vm1032_vm3, %v1264_v62  ;;  %3277 = vmatmul.mubr.msk.f32.vlgmr.msra.gmra.mxu0 %vm1032_vm3, %v870_v52 }
 0x17e   : > { %3280 = vmatpush3.xpose.msk.msra.mxu1 %vm1032_vm3, %v953_v53  ;;  %3285 = vmatpush3.xpose.msk.msra.mxu0 %vm1032_vm3, %v1496_v63 }
 0x17f   : > { %3286 = vmatprep.mubr.msk.f32.mxu0 %vm3612_vm2, %v3611_v8  ;;  %3281 = vmatprep.mubr.msk.f32.mxu1 %vm3612_vm2, %v3611_v8 }
 0x180   : > { %v1494_v2 = vpop.permute.xlu1 %1493  ;;  %3289 = vmatprep.subr.mxu1 %v3611_v8  ;;  %3294 = vmatprep.subr.mxu0 %v3611_v8 }
 0x181   : > { %v1574_v3 = vpop.permute.xlu0 %1573  ;;  %3282 = vmatmul.mubr.msk.f32.vlgmr.msra.gmra.mxu1 %vm1032_vm3, %v876_v55  ;;  %3287 = vmatmul.mubr.msk.f32.vlgmr.msra.gmra.mxu0 %vm1032_vm3, %v1494_v2 }
 0x182   : > { %3290 = vmatpush3.xpose.msk.msra.mxu1 %vm1032_vm3, %v1574_v3  ;;  %3291 = vmatprep.mubr.msk.f32.mxu1 %vm3612_vm2, %v3611_v8 }
 0x183   : > { %3295 = vmatpush3.msra.mxu0 %v3942_v1  ;;  %3299 = vmatprep.subr.mxu1 %v3611_v8 }
 0x184   : > { %v1572_v6 = vpop.permute.xlu1 %1571  ;;  %3296 = vmatprep.mubr.msk.f32.mxu0 %vm3612_vm2, %v3611_v8  ;;  %3304 = vmatprep.subr.mxu0 %v3611_v8 }
 0x185   : > { %3292 = vmatmul.mubr.msk.f32.vlgmr.msra.gmra.mxu1 %vm1032_vm3, %v1572_v6 }
 0x186   : > { %3300 = vmatpush3.msra.mxu1 %v3951_v5  ;;  %3301 = vmatprep.mubr.msk.f32.mxu1 %vm3612_vm2, %v3611_v8 }
 0x187   : > { %3309 = vmatprep.subr.mxu1 %v3611_v8 }
 0x1c5   : > { %v1105_v24 = vpop.f32.mrf.mxu1 }
 0x1c6   : > { %v1689_v25 = vsel %vm3968_vm6, -1e+09, %v1105_v24 }
 0x1c7   : > { %v3258_v26 = vpop.f32.mrf.mxu1  ;;  %v1698_v27 = vsel %vm1697_vm7, %v1689_v25, -inf }
 0x1c8   : > { %1699 = vmax.xlane.f32.xlu0 %v1698_v27 }
 0x1ca   : > { %v1181_v29 = vpop.f32.mrf.mxu1 }
 0x1cb   : > { %v1693_v31 = vsel %vm3976_vm8, -1e+09, %v1181_v29 }
 0x1cc   : > { %v1710_v34 = vsel %vm1697_vm7, %v1693_v31, -inf  ;;  %v3263_v35 = vpop.f32.mrf.mxu1 }
 0x1cd   : > { %1711 = vmax.xlane.f32.xlu0 %v1710_v34 }
 0x239   : > { %v1259_v36 = vpop.f32.mrf.mxu0 }
 0x23a   : > { %v1690_v37 = vsel %vm3968_vm6, -1e+09, %v1259_v36 }
 0x23b   : > { %v3268_v38 = vpop.f32.mrf.mxu0  ;;  %v1701_v39 = vsel %vm1697_vm7, %v1690_v37, -inf }
 0x23c   : > { %1702 = vmax.xlane.f32.xlu1 %v1701_v39 }
 0x23d   : > { %v1337_v40 = vpop.f32.mrf.mxu1  ;;  %v1413_v41 = vpop.f32.mrf.mxu0 }
 0x23e   : > { %v1694_v42 = vsel %vm3976_vm8, -1e+09, %v1337_v40  ;;  %v1691_v43 = vsel %vm3968_vm6, -1e+09, %v1413_v41 }
 0x23f   : > { %v3273_v44 = vpop.f32.mrf.mxu1  ;;  %v3278_v45 = vpop.f32.mrf.mxu0  ;;  %v1704_v46 = vsel %vm1697_vm7, %v1691_v43, -inf  ;;  %v1713_v47 = vsel %vm1697_vm7, %v1694_v42, -inf }
 0x240   : > { %1705 = vmax.xlane.f32.xlu0 %v1704_v46  ;;  %1714 = vmax.xlane.f32.xlu1 %v1713_v47  ;;  %v786_v44 = vsub.s32 5, %v3887_v30 }
 0x241   : > { %v1489_v48 = vpop.f32.mrf.mxu1  ;;  %v1567_v49 = vpop.f32.mrf.mxu0 }
 0x242   : > { %v1695_v50 = vsel %vm3976_vm8, -1e+09, %v1489_v48  ;;  %v1692_v51 = vsel %vm3968_vm6, -1e+09, %v1567_v49  ;;  %v787_v45 = vrot.slane %v3891_v32, %v786_v44  ;;  %v2432_v44 = vld [vmem:[%s3774_s24 + $0x90] sm:$0xff] }
 0x243   : > { %v3283_v52 = vpop.f32.mrf.mxu1  ;;  %v3288_v53 = vpop.f32.mrf.mxu0  ;;  %v1707_v54 = vsel %vm1697_vm7, %v1692_v51, -inf  ;;  %v1716_v55 = vsel %vm1697_vm7, %v1695_v50, -inf }
 0x244   : > { %1708 = vmax.xlane.f32.xlu0 %v1707_v54  ;;  %1717 = vmax.xlane.f32.xlu1 %v1716_v55  ;;  %v1024_v46 = vadd.f32 %v3934_v0, %v787_v45  ;;  %v1030_v47 = vadd.f32 %v3983_v33, %v787_v45  ;;  %v2416_v45 = vld [vmem:[%s3774_s24 + $0x10] sm:$0xff] }
 0x245   : > { %v1645_v56 = vpop.f32.mrf.mxu1 }
 0x246   : > { %v1696_v57 = vsel %vm3976_vm8, -1e+09, %v1645_v56 }
 0x247   : > { %v3293_v58 = vpop.f32.mrf.mxu1  ;;  %v1719_v59 = vsel %vm1697_vm7, %v1696_v57, -inf }
 0x248   : > { %1720 = vmax.xlane.f32.xlu0 %v1719_v59 }
 0x251   : > { %v1700_v60 = vpop.xlane.xlu0 %1699 }
 0x252   : > { %v1722_v61 = vsub.f32 %v1689_v25, %v1700_v60 }
 0x254   : > { %v1730_v63 = vmul.f32 1.442695, %v1722_v61 }
 0x255   : > { %1941 = vrot.lane.b32.xlu1 %v3942_v1, %s3613_s4 }
 0x256   : > { %v1712_v62 = vpop.xlane.xlu0 %1711  ;;  %3461 = vpow2.f32 %v1730_v63 }
 0x257   : > { %v1726_v2 = vsub.f32 %v1693_v31, %v1712_v62 }
 0x259   : > { %v1738_v3 = vmul.f32 1.442695, %v1726_v2 }
 0x25b   : > { %3463 = vpow2.f32 %v1738_v3 }
 0x263   : > { %v3462_v4 = vpop.eup %3461 }
 0x264   : > { %v1746_v6 = vsel %vm1697_vm7, %v3462_v4, 0.0 }
 0x268   : > { %v4006_v7 = vpop.eup %3463 }
 0x269   : > { %v1758_v9 = vsel %vm1697_vm7, %v4006_v7, 0.0 }
 0x279   : > { %1747 = vadd.xlane.f32.xlu1 %v1746_v6 }
 0x27d   : > { %1759 = vadd.xlane.f32.xlu1 %v1758_v9 }
 0x2c5   : > { %v1703_v10 = vpop.xlane.xlu1 %1702 }
 0x2c6   : > { %v1723_v1 = vsub.f32 %v1690_v37, %v1703_v10 }
 0x2c8   : > { %v1732_v11 = vmul.f32 1.442695, %v1723_v1  ;;  %v2445_v1 = vld [vmem:[%s3774_s24 + $0xf8] sm:$0xff] }
 0x2c9   : > { %v1706_v12 = vpop.xlane.xlu0 %1705  ;;  %v1715_v13 = vpop.xlane.xlu1 %1714 }
 0x2ca   : > { %3465 = vpow2.f32 %v1732_v11  ;;  %v1724_v14 = vsub.f32 %v1691_v43, %v1706_v12  ;;  %v1727_v15 = vsub.f32 %v1694_v42, %v1715_v13  ;;  %v2429_v11 = vld [vmem:[%s3774_s24 + $0x78] sm:$0xff]  ;;  %v2444_v12 = vld [vmem:[%s3774_s24 + $0xf0] sm:$0xff] }
 0x2cb   : > { %v2428_v13 = vld [vmem:[%s3774_s24 + $0x70] sm:$0xff] }
 0x2cc   : > { %v1734_v16 = vmul.f32 1.442695, %v1724_v14  ;;  %v1740_v17 = vmul.f32 1.442695, %v1727_v15  ;;  %v2443_v14 = vld [vmem:[%s3774_s24 + $0xe8] sm:$0xff]  ;;  %v2442_v15 = vld [vmem:[%s3774_s24 + $0xe0] sm:$0xff] }
 0x2cd   : > { %v1709_v19 = vpop.xlane.xlu0 %1708  ;;  %v1718_v21 = vpop.xlane.xlu1 %1717 }
 0x2ce   : > { %3467 = vpow2.f32 %v1734_v16  ;;  %v1725_v22 = vsub.f32 %v1692_v51, %v1709_v19  ;;  %v1728_v23 = vsub.f32 %v1695_v50, %v1718_v21  ;;  %v2426_v16 = vld [vmem:[%s3774_s24 + $0x60] sm:$0xff]  ;;  %v2425_v19 = vld [vmem:[%s3774_s24 + $0x58] sm:$0xff]  ;;  %v2440_v21 = vld [vmem:[%s3774_s24 + $0xd0] sm:$0xff] }
 0x2cf   : > { %3469 = vpow2.f32 %v1740_v17  ;;  %v2441_v17 = vld [vmem:[%s3774_s24 + $0xd8] sm:$0xff] }
 0x2d0   : > { %v1736_v24 = vmul.f32 1.442695, %v1725_v22  ;;  %v1742_v25 = vmul.f32 1.442695, %v1728_v23  ;;  %v2424_v22 = vld [vmem:[%s3774_s24 + $0x50] sm:$0xff]  ;;  %v2439_v23 = vld [vmem:[%s3774_s24 + $0xc8] sm:$0xff] }
 0x2d1   : > { %v1721_v26 = vpop.xlane.xlu0 %1720  ;;  %v1942_v48 = vpop.permute.xlu1 %1941 }
 0x2d2   : > { %3471 = vpow2.f32 %v1736_v24  ;;  %v1729_v27 = vsub.f32 %v1696_v57, %v1721_v26  ;;  %v2423_v24 = vld [vmem:[%s3774_s24 + $0x48] sm:$0xff]  ;;  %v2422_v26 = vld [vmem:[%s3774_s24 + $0x40] sm:$0xff] }
 0x2d3   : > { %3473 = vpow2.f32 %v1742_v25  ;;  %v2438_v25 = vld [vmem:[%s3774_s24 + $0xc0] sm:$0xff] }
 0x2d4   : > { %v1744_v28 = vmul.f32 1.442695, %v1729_v27  ;;  %v2437_v27 = vld [vmem:[%s3774_s24 + $0xb8] sm:$0xff] }
 0x2d6   : > { %3475 = vpow2.f32 %v1744_v28  ;;  %v2421_v28 = vld [vmem:[%s3774_s24 + $0x38] sm:$0xff] }
 0x2d7   : > { %v3466_v29 = vpop.eup %3465 }
 0x2d8   : > { %v1749_v31 = vsel %vm1697_vm7, %v3466_v29, 0.0 }
 0x2d9   : > { %1750 = vadd.xlane.f32.xlu0 %v1749_v31  ;;  %v2436_v31 = vld [vmem:[%s3774_s24 + $0xb0] sm:$0xff] }
 0x2db   : > { %v4011_v34 = vpop.eup %3467 }
 0x2dc   : > { %v4013_v35 = vpop.eup %3469  ;;  %v1752_v36 = vsel %vm1697_vm7, %v4011_v34, 0.0 }
 0x2dd   : > { %v1761_v37 = vsel %vm1697_vm7, %v4013_v35, 0.0  ;;  %1753 = vadd.xlane.f32.xlu0 %v1752_v36  ;;  %v2435_v36 = vld [vmem:[%s3774_s24 + $0xa8] sm:$0xff] }
 0x2de   : > { %1762 = vadd.xlane.f32.xlu1 %v1761_v37  ;;  %v2419_v37 = vld [vmem:[%s3774_s24 + $0x28] sm:$0xff] }
 0x2df   : > { %v4019_v38 = vpop.eup %3471 }
 0x2e0   : > { %v4021_v39 = vpop.eup %3473  ;;  %v1755_v40 = vsel %vm1697_vm7, %v4019_v38, 0.0 }
 0x2e1   : > { %v1764_v41 = vsel %vm1697_vm7, %v4021_v39, 0.0  ;;  %1756 = vadd.xlane.f32.xlu0 %v1755_v40  ;;  %v2418_v40 = vld [vmem:[%s3774_s24 + $0x20] sm:$0xff] }
 0x2e2   : > { %1765 = vadd.xlane.f32.xlu1 %v1764_v41 }
 0x2e3   : > { %v4027_v42 = vpop.eup %3475 }
 0x2e4   : > { %v1767_v43 = vsel %vm1697_vm7, %v4027_v42, 0.0 }
 0x2e5   : > { %1768 = vadd.xlane.f32.xlu0 %v1767_v43  ;;  %v2417_v43 = vld [vmem:[%s3774_s24 + $0x18] sm:$0xff] }
 0x2f3   : > { %2241 = vrot.lane.b32.xlu1 %v1024_v46, %s3613_s4 }
 0x2f7   : > { %2318 = vrot.lane.b32.xlu1 %v1030_v47, %s3613_s4 }
 0x2fb   : > { %2018 = vrot.lane.b32.xlu0 %v3951_v5, %s3613_s4 }
 0x302   : > { %v1748_v49 = vpop.xlane.xlu1 %1747 }
 0x303   : > { %3477 = vrcp.f32 %v1748_v49  ;;  %v2414_v49 = vld [vmem:[%s3774_s24] sm:$0xff] }
 0x306   : > { %v1760_v50 = vpop.xlane.xlu1 %1759 }
 0x307   : > { %3479 = vrcp.f32 %v1760_v50 }
 0x310   : > { %v3478_v30 = vpop.eup %3477 }
 0x311   : > { %v1778_v51 = vmul.f32 %v3478_v30, %v3462_v4 }
 0x313   : > { %1786 = vst.msk [vmem:[%s3826_s14] sm:$0xff] %vm1697_vm7, %v1778_v51  ;;  %3297 = vmatmul.mubr.msk.f32.vlgmr.msra.gmra.mxu0 %vm1697_vm7, %v1778_v51 }
 0x314   : > { %v3480_v32 = vpop.eup %3479  ;;  %3305 = vmatpush3.msra.mxu0 %v1942_v48  ;;  %3306 = vmatprep.mubr.msk.f32.mxu0 %vm3612_vm2, %v3611_v8  ;;  %v2430_v48 = vld [vmem:[%s3774_s24 + $0x80] sm:$0xff] }
 0x315   : > { %v1782_v0 = vmul.f32 %v3480_v32, %v4006_v7  ;;  %3314 = vmatprep.subr.mxu0 %v3611_v8 }
 0x317   : > { %1790 = vst.msk [vmem:[%s3826_s14 + $0x20] sm:$0xff] %vm1697_vm7, %v1782_v0  ;;  %3302 = vmatmul.mubr.msk.f32.vlgmr.msra.gmra.mxu1 %vm1697_vm7, %v1782_v0 }
 0x318   : > { %3311 = vmatprep.mubr.msk.f32.mxu1 %vm3612_vm2, %v3611_v8 }
 0x362   : > { %v1751_v5 = vpop.xlane.xlu0 %1750 }
 0x363   : > { %3481 = vrcp.f32 %v1751_v5 }
 0x366   : > { %v1754_v33 = vpop.xlane.xlu0 %1753 }
 0x367   : > { %v1763_v52 = vpop.xlane.xlu1 %1762  ;;  %3483 = vrcp.f32 %v1754_v33 }
 0x368   : > { %3485 = vrcp.f32 %v1763_v52 }
 0x36a   : > { %v1757_v53 = vpop.xlane.xlu0 %1756 }
 0x36b   : > { %v1766_v54 = vpop.xlane.xlu1 %1765  ;;  %3487 = vrcp.f32 %v1757_v53 }
 0x36c   : > { %3489 = vrcp.f32 %v1766_v54 }
 0x36e   : > { %v1769_v55 = vpop.xlane.xlu0 %1768 }
 0x36f   : > { %3491 = vrcp.f32 %v1769_v55  ;;  %v2242_v62 = vpop.permute.xlu1 %2241 }
 0x370   : > { %v3482_v56 = vpop.eup %3481 }
 0x371   : > { %v1779_v57 = vmul.f32 %v3482_v56, %v3466_v29 }
 0x372   : > { %v2019_v58 = vpop.permute.xlu0 %2018 }
 0x373   : > { %1787 = vst.msk [vmem:[%s3826_s14 + $0x8] sm:$0xff] %vm1697_vm7, %v1779_v57  ;;  %3307 = vmatmul.mubr.msk.f32.vlgmr.msra.gmra.mxu0 %vm1697_vm7, %v1779_v57  ;;  %3310 = vmatpush3.msra.mxu1 %v2019_v58  ;;  %v2319_v9 = vpop.permute.xlu1 %2318 }
 0x374   : > { %v3484_v59 = vpop.eup %3483  ;;  %3315 = vmatpush3.msra.mxu0 %v1024_v46  ;;  %3316 = vmatprep.mubr.msk.f32.mxu0 %vm3612_vm2, %v3611_v8  ;;  %v2431_v46 = vld [vmem:[%s3774_s24 + $0x88] sm:$0xff] }
 0x375   : > { %v3486_v60 = vpop.eup %3485  ;;  %3319 = vmatprep.subr.mxu1 %v3611_v8  ;;  %3324 = vmatprep.subr.mxu0 %v3611_v8  ;;  %v1780_v61 = vmul.f32 %v3484_v59, %v4011_v34  ;;  %v2420_v34 = vld [vmem:[%s3774_s24 + $0x30] sm:$0xff] }
 0x376   : > { %v1783_v63 = vmul.f32 %v3486_v60, %v4013_v35 }
 0x377   : > { %1788 = vst.msk [vmem:[%s3826_s14 + $0x10] sm:$0xff] %vm1697_vm7, %v1780_v61  ;;  %3317 = vmatmul.mubr.msk.f32.vlgmr.msra.gmra.mxu0 %vm1697_vm7, %v1780_v61 }
 0x378   : > { %v3488_v2 = vpop.eup %3487  ;;  %1791 = vst.msk [vmem:[%s3826_s14 + $0x28] sm:$0xff] %vm1697_vm7, %v1783_v63  ;;  %3312 = vmatmul.mubr.msk.f32.vlgmr.msra.gmra.mxu1 %vm1697_vm7, %v1783_v63  ;;  %3325 = vmatpush3.msra.mxu0 %v2242_v62 }
 0x379   : > { %v3490_v3 = vpop.eup %3489  ;;  %3320 = vmatpush3.msra.mxu1 %v1030_v47  ;;  %3321 = vmatprep.mubr.msk.f32.mxu1 %vm3612_vm2, %v3611_v8  ;;  %v1781_v4 = vmul.f32 %v3488_v2, %v4019_v38  ;;  %v2415_v47 = vld [vmem:[%s3774_s24 + $0x8] sm:$0xff] }
 0x37a   : > { %3326 = vmatprep.mubr.msk.f32.mxu0 %vm3612_vm2, %v3611_v8  ;;  %3329 = vmatprep.subr.mxu1 %v3611_v8  ;;  %v1784_v6 = vmul.f32 %v3490_v3, %v4021_v39  ;;  %v2434_v39 = vld [vmem:[%s3774_s24 + $0xa0] sm:$0xff] }
 0x37b   : > { %1789 = vst.msk [vmem:[%s3826_s14 + $0x18] sm:$0xff] %vm1697_vm7, %v1781_v4  ;;  %3327 = vmatmul.mubr.msk.f32.vlgmr.msra.gmra.mxu0 %vm1697_vm7, %v1781_v4  ;;  %3192 = vmatprep.subr.mxu0 %v2445_v1 }
 0x37c   : > { %v3492_v7 = vpop.eup %3491  ;;  %1792 = vst.msk [vmem:[%s3826_s14 + $0x30] sm:$0xff] %vm1697_vm7, %v1784_v6  ;;  %3322 = vmatmul.mubr.msk.f32.vlgmr.msra.gmra.mxu1 %vm1697_vm7, %v1784_v6  ;;  %3193 = vmatpush3.msra.mxu0 %v2429_v11 }
 0x37d   : > { %3330 = vmatpush3.msra.mxu1 %v2319_v9  ;;  %3331 = vmatprep.mubr.msk.f32.mxu1 %vm3612_vm2, %v3611_v8  ;;  %v1785_v10 = vmul.f32 %v3492_v7, %v4027_v42  ;;  %v2427_v8 = vld [vmem:[%s3774_s24 + $0x68] sm:$0xff]  ;;  %v2433_v42 = vld [vmem:[%s3774_s24 + $0x98] sm:$0xff]  ;;  %s3159_s24 = sshll.u32 %s4340_s1, 10 }
 0x37e   : > { %3194 = vmatprep.subr.mxu0 %v2444_v12 }
 0x37f   : > { %1793 = vst.msk [vmem:[%s3826_s14 + $0x38] sm:$0xff] %vm1697_vm7, %v1785_v10  ;;  %3195 = vmatpush3.msra.mxu0 %v2428_v13 }
 0x380   : > { %3332 = vmatmul.mubr.msk.f32.vlgmr.msra.gmra.mxu1 %vm1697_vm7, %v1785_v10  ;;  %3196 = vmatprep.subr.mxu0 %v2443_v14  ;;  %v3140_v10 = vld [vmem:[%s4336_s30] ss:$0 sm:$0xff] }
 0x381   : > { %3197 = vmatpush3.msra.mxu0 %v2427_v8 }
 0x382   : > { %3198 = vmatprep.subr.mxu0 %v2442_v15 }
 0x383   : > { %3199 = vmatpush3.msra.mxu0 %v2426_v16 }
 0x384   : > { %3200 = vmatprep.subr.mxu0 %v2441_v17 }
 0x385   : > { %3201 = vmatpush3.msra.mxu0 %v2425_v19 }
 0x386   : > { %3202 = vmatprep.subr.mxu0 %v2440_v21 }
 0x387   : > { %3203 = vmatpush3.msra.mxu0 %v2424_v22 }
 0x388   : > { %3204 = vmatprep.subr.mxu0 %v2439_v23 }
 0x389   : > { %3205 = vmatpush3.msra.mxu0 %v2423_v24 }
 0x38a   : > { %3206 = vmatprep.subr.mxu0 %v2438_v25 }
 0x38b   : > { %3207 = vmatpush3.msra.mxu0 %v2422_v26 }
 0x38c   : > { %3208 = vmatprep.subr.mxu0 %v2437_v27 }
 0x38d   : > { %3209 = vmatpush3.msra.mxu0 %v2421_v28 }
 0x38e   : > { %3210 = vmatprep.subr.mxu0 %v2436_v31 }
 0x38f   : > { %3211 = vmatpush3.msra.mxu0 %v2420_v34  ;;  %v2577_v34 = vld [vmem:[%s3802_s2 + $0x10] sm:$0xff] }
 0x390   : > { %3212 = vmatprep.subr.mxu0 %v2435_v36  ;;  %v2575_v36 = vld [vmem:[%s3802_s2] sm:$0xff] }
 0x391   : > { %3213 = vmatpush3.msra.mxu0 %v2419_v37 }
 0x392   : > { %3214 = vmatprep.subr.mxu0 %v2434_v39 }
 0x393   : > { %3215 = vmatpush3.msra.mxu0 %v2418_v40 }
 0x394   : > { %3216 = vmatprep.subr.mxu0 %v2433_v42 }
 0x395   : > { %3217 = vmatpush3.msra.mxu0 %v2417_v43 }
 0x396   : > { %3218 = vmatprep.subr.mxu0 %v2432_v44  ;;  %v3141_v44 = vld [vmem:[%s4337_s28] ss:$0 sm:$0xff]  ;;  %s4192_s28 = scalar_lea.hbm %s4343_s18, %s3159_s24 }
 0x397   : > { %3219 = vmatpush3.msra.mxu0 %v2416_v45 }
 0x398   : > { %3220 = vmatprep.subr.mxu0 %v2431_v46  ;;  %v3142_v46 = vld [vmem:[%s4338_s29] ss:$0 sm:$0xff]  ;;  %s4199_s29 = scalar_lea.sflag [#allocation5], %s4345_s15 }
 0x399   : > { %3221 = vmatpush3.msra.mxu0 %v2415_v47 }
 0x39a   : > { %3222 = vmatprep.subr.mxu0 %v2430_v48 }
 0x39b   : > { %3223 = vmatpush3.msra.mxu0 %v2414_v49 }
 0x3d3   : > { %v1863_v29 = vpop.f32.mrf.mxu0 }
 0x3d5   : > { %v3298_v35 = vpop.f32.mrf.mxu0 }
 0x3d6   : > { %v2576_v35 = vld [vmem:[%s3802_s2 + $0x8] sm:$0xff] }
 0x3d7   : > { %v1936_v38 = vpop.f32.mrf.mxu1 }
 0x3d9   : > { %v3303_v41 = vpop.f32.mrf.mxu1 }
 0x433   : > { %v2013_v50 = vpop.f32.mrf.mxu0 }
 0x435   : > { %v3308_v30 = vpop.f32.mrf.mxu0 }
 0x437   : > { %v2163_v51 = vpop.f32.mrf.mxu0 }
 0x438   : > { %v2090_v32 = vpop.f32.mrf.mxu1 }
 0x439   : > { %v3318_v0 = vpop.f32.mrf.mxu0 }
 0x43a   : > { %v3313_v5 = vpop.f32.mrf.mxu1  ;;  %v2699_v0 = vld [vmem:[%s3816_s17 + $0x70] sm:$0xff] }
 0x43b   : > { %v2313_v33 = vpop.f32.mrf.mxu0  ;;  %v2698_v5 = vld [vmem:[%s3816_s17 + $0x68] sm:$0xff] }
 0x43c   : > { %v2236_v52 = vpop.f32.mrf.mxu1  ;;  %v3451_v53 = vpack.i.bf16 %v2013_v50, %v2313_v33  ;;  %v2697_v33 = vld [vmem:[%s3816_s17 + $0x60] sm:$0xff] }
 0x43d   : > { %v3328_v54 = vpop.f32.mrf.mxu0 }
 0x43e   : > { %v3323_v55 = vpop.f32.mrf.mxu1  ;;  %3452 = vrot.lane.b32.xlu0 %v3451_v53, %s3613_s4  ;;  %v2695_v53 = vld [vmem:[%s3816_s17 + $0x50] sm:$0xff]  ;;  %v2694_v54 = vld [vmem:[%s3816_s17 + $0x48] sm:$0xff] }
 0x43f   : > { %v2693_v55 = vld [vmem:[%s3816_s17 + $0x40] sm:$0xff] }
 0x440   : > { %v2390_v56 = vpop.f32.mrf.mxu1 }
 0x441   : > { %v3456_v57 = vpack.i.bf16 %v2090_v32, %v2390_v56  ;;  %v2700_v32 = vld [vmem:[%s3816_s17 + $0x78] sm:$0xff] }
 0x442   : > { %v3333_v58 = vpop.f32.mrf.mxu1  ;;  %v2692_v56 = vld [vmem:[%s3816_s17 + $0x38] sm:$0xff] }
 0x443   : > { %3457 = vrot.lane.b32.xlu1 %v3456_v57, %s3613_s4  ;;  %v2691_v57 = vld [vmem:[%s3816_s17 + $0x30] sm:$0xff]  ;;  %v2690_v58 = vld [vmem:[%s3816_s17 + $0x28] sm:$0xff]  ;;  %s4339_s4 = scalar_lea.vmem %s4284_s11, %s3766_s26 }
 0x4b0   : > { %v3453_v59 = vpop.permute.xlu0 %3452 }
 0x4b1   : > { %v3455_v60 = vunpack.i.h.bf16 %v3453_v59  ;;  %v3454_v61 = vunpack.i.l.bf16 %v3453_v59  ;;  %v2689_v59 = vld [vmem:[%s3816_s17 + $0x20] sm:$0xff] }
 0x4b3   : > { %v2412_v62 = vsel %vm1032_vm3, %v2163_v51, %v3454_v61  ;;  %v2410_v63 = vsel %vm1032_vm3, %v1863_v29, %v3455_v60  ;;  %v2688_v60 = vld [vmem:[%s3816_s17 + $0x18] sm:$0xff]  ;;  %v2687_v61 = vld [vmem:[%s3816_s17 + $0x10] sm:$0xff] }
 0x4b4   : > { %2517 = vmatprep.mubr.f32.mxu0 %v2412_v62  ;;  %v2686_v62 = vld [vmem:[%s3816_s17 + $0x8] sm:$0xff] }
 0x4b5   : > { %v3458_v2 = vpop.permute.xlu1 %3457  ;;  %2518 = vmatmul.mubr.f32.vlgmr.msra.gmra.mxu0 %v2410_v63  ;;  %v2685_v63 = vld [vmem:[%s3816_s17] sm:$0xff] }
 0x4b6   : > { %v3460_v3 = vunpack.i.h.bf16 %v3458_v2  ;;  %v3459_v4 = vunpack.i.l.bf16 %v3458_v2  ;;  %v3143_v2 = vld [vmem:[%s710_s19] ss:$0 sm:$0xff]  ;;  %s3509_s19 = sshll.u32 %s3616_s22, 4  ;;  %s3510_s19 = int_to_ptr.vmem [resolvable:$false] %s3509_s19 }
 0x4b8   : > { %v2413_v6 = vsel %vm1032_vm3, %v2236_v52, %v3459_v4  ;;  %v2411_v7 = vsel %vm1032_vm3, %v1936_v38, %v3460_v3  ;;  %v2696_v52 = vld [vmem:[%s3816_s17 + $0x58] sm:$0xff]  ;;  %s3511_s17 = scalar_lea.vmem %s3510_s19, 2048 }
 0x4b9   : > { %2522 = vmatprep.mubr.f32.mxu0 %v2413_v6 }
 0x4ba   : > { %2523 = vmatmul.mubr.f32.gmra.mxu0 %v2411_v7 }
 0x575   : > { %v3224_v9 = vpop.f32.mrf.mxu0 }
 0x577   : > { %v3225_v1 = vpop.f32.mrf.mxu0 }
 0x578   : > { %v3226_v11 = vadd.f32 %v3225_v1, %v3224_v9 }
 0x57a   : > { %v2520_v12 = vadd.f32 %v3226_v11, %v3140_v10  ;;  %v3227_v13 = vpop.f32.mrf.mxu0 }
 0x57c   : > { %v3228_v14 = vpop.f32.mrf.mxu0  ;;  %v2528_v8 = vadd.f32 %v2520_v12, %v3851_v18 }
 0x57d   : > { %v3229_v15 = vadd.f32 %v3228_v14, %v3227_v13 }
 0x57e   : > { %v2532_v16 = vsel %vm794_vm1, %v2528_v8, 0.0 }
 0x57f   : > { %v2525_v17 = vadd.f32 %v3229_v15, %v3140_v10  ;;  %2533 = vadd.xlane.f32.xlu0 %v2532_v16 }
 0x581   : > { %v2529_v19 = vadd.f32 %v2525_v17, %v3858_v20  ;;  %v2578_v20 = vld [vmem:[%s3802_s2 + $0x18] sm:$0xff]  ;;  %s2864_s2 = sshll.u32 %s3826_s14, 4  ;;  %s4195_s2 = int_to_ptr.vmem [resolvable:$true] %s2864_s2 }
 0x582   : > { %3334 = vmatprep.subr.mxu1 %v2578_v20  ;;  %s3505_s20 = scalar_lea.vmem %s4195_s2, 1024  ;;  %p3512_p3 = scmp.lt.s32.totalorder %s4195_s2, %s3510_s19 }
 0x583   : > { %v2535_v21 = vsel %vm794_vm1, %v2529_v19, 0.0  ;;  %3335 = vmatpush3.msra.mxu1 %v2578_v20  ;;  %p3506_p13 = scmp.ne.s32.totalorder %s4195_s2, %s3505_s20  ;;  %p3513_p5 = scmp.lt.s32.totalorder %s3511_s17, %s3505_s20 }
 0x584   : > { %2536 = vadd.xlane.f32.xlu1 %v2535_v21  ;;  %3336 = vmatprep.subr.mxu1 %v2577_v34 }
 0x585   : > { %3337 = vmatpush3.msra.mxu1 %v2577_v34  ;;  %p3507_p0 = pnand %p3506_p13, %p3746_p4  ;;  %p3514_p6 = por %p3513_p5, %p3512_p3 }
 0x586   : > { %3338 = vmatprep.subr.mxu1 %v2576_v35 }
 0x587   : > { %3339 = vmatpush3.msra.mxu1 %v2576_v35  ;;  %p3508_p1 = pneg %p3507_p0 }
 0x588   : > { %3340 = vmatprep.subr.mxu1 %v2575_v36 }
 0x589   : > { %3341 = vmatpush3.msra.mxu1 %v2575_v36  ;;  %p3515_p7 = pnand %p3514_p6, %p3508_p1 }
 0x58a   : > { %3345 = vmatprep.subr.mxu1 %v2700_v32 }
 0x608   : > { %v2534_v22 = vpop.xlane.xlu0 %2533 }
 0x609   : > { %v2539_v23 = vmul.f32 0.03125, %v2534_v22 }
 0x60b   : > { %v2541_v24 = vsub.f32 %v2528_v8, %v2539_v23 }
 0x60d   : > { %v2537_v25 = vpop.xlane.xlu1 %2536  ;;  %v2543_v26 = vmul.f32 %v2541_v24, %v2541_v24 }
 0x60e   : > { %v2540_v27 = vmul.f32 0.03125, %v2537_v25 }
 0x60f   : > { %v2545_v18 = vsel %vm794_vm1, %v2543_v26, 0.0 }
 0x610   : > { %v2542_v28 = vsub.f32 %v2529_v19, %v2540_v27  ;;  %2546 = vadd.xlane.f32.xlu0 %v2545_v18  ;;  %v3146_v27 = vld [vmem:[%s4339_s4] ss:$0 sm:$0xff] }
 0x612   : > { %v2544_v29 = vmul.f32 %v2542_v28, %v2542_v28 }
 0x614   : > { %v2548_v31 = vsel %vm794_vm1, %v2544_v29, 0.0 }
 0x615   : > { %2549 = vadd.xlane.f32.xlu0 %v2548_v31 }
 0x699   : > { %v2547_v37 = vpop.xlane.xlu0 %2546 }
 0x69a   : > { %v2551_v38 = vmul.f32 0.03125, %v2547_v37 }
 0x69c   : > { %v2553_v39 = vadd.f32 1e-12, %v2551_v38 }
 0x69e   : > { %3493 = vrsqrt.f32 %v2553_v39  ;;  %v2550_v40 = vpop.xlane.xlu0 %2549 }
 0x69f   : > { %v2552_v41 = vmul.f32 0.03125, %v2550_v40 }
 0x6a1   : > { %v2554_v42 = vadd.f32 1e-12, %v2552_v41 }
 0x6a3   : > { %3495 = vrsqrt.f32 %v2554_v42 }
 0x6ab   : > { %v3494_v43 = vpop.eup %3493 }
 0x6ac   : > { %v2557_v45 = vmul.f32 %v3494_v43, %v2541_v24 }
 0x6ae   : > { %v2565_v47 = vmul.f32 %v3141_v44, %v2557_v45 }
 0x6b0   : > { %v3496_v48 = vpop.eup %3495  ;;  %v4148_v49 = vadd.f32 %v3142_v46, %v2565_v47 }
 0x6b1   : > { %v2558_v50 = vmul.f32 %v3496_v48, %v2542_v28 }
 0x6b2   : > { %3342 = vmatprep.mubr.msk.f32.mxu1 %vm794_vm1, %v4148_v49 }
 0x6b3   : > { %v2566_v30 = vmul.f32 %v3141_v44, %v2558_v50 }
 0x6b5   : > { %v4152_v51 = vadd.f32 %v3142_v46, %v2566_v30 }
 0x6b7   : > { %3343 = vmatmul.mubr.msk.f32.vlgmr.msra.gmra.mxu1 %vm794_vm1, %v4152_v51 }
 0x6b8   : > { %3346 = vmatpush3.msra.mxu1 %v2700_v32 }
 0x6b9   : > { %3347 = vmatprep.subr.mxu1 %v2699_v0 }
 0x6ba   : > { %3348 = vmatpush3.msra.mxu1 %v2699_v0 }
 0x6bb   : > { %3349 = vmatprep.subr.mxu1 %v2698_v5 }
 0x6bc   : > { %3350 = vmatpush3.msra.mxu1 %v2698_v5 }
 0x6bd   : > { %3351 = vmatprep.subr.mxu1 %v2697_v33 }
 0x6be   : > { %3352 = vmatpush3.msra.mxu1 %v2697_v33 }
 0x6bf   : > { %3353 = vmatprep.subr.mxu1 %v2696_v52 }
 0x6c0   : > { %3354 = vmatpush3.msra.mxu1 %v2696_v52 }
 0x6c1   : > { %3355 = vmatprep.subr.mxu1 %v2695_v53 }
 0x6c2   : > { %3356 = vmatpush3.msra.mxu1 %v2695_v53 }
 0x6c3   : > { %3357 = vmatprep.subr.mxu1 %v2694_v54 }
 0x6c4   : > { %3358 = vmatpush3.msra.mxu1 %v2694_v54 }
 0x6c5   : > { %3359 = vmatprep.subr.mxu1 %v2693_v55 }
 0x6c6   : > { %3360 = vmatpush3.msra.mxu1 %v2693_v55 }
 0x6c7   : > { %3361 = vmatprep.subr.mxu1 %v2692_v56 }
 0x6c8   : > { %3362 = vmatpush3.msra.mxu1 %v2692_v56 }
 0x6c9   : > { %3363 = vmatprep.subr.mxu1 %v2691_v57 }
 0x6ca   : > { %3364 = vmatpush3.msra.mxu1 %v2691_v57 }
 0x6cb   : > { %3365 = vmatprep.subr.mxu1 %v2690_v58 }
 0x6cc   : > { %3366 = vmatpush3.msra.mxu1 %v2690_v58 }
 0x6cd   : > { %3367 = vmatprep.subr.mxu1 %v2689_v59 }
 0x6ce   : > { %3368 = vmatpush3.msra.mxu1 %v2689_v59 }
 0x6cf   : > { %3369 = vmatprep.subr.mxu1 %v2688_v60 }
 0x6d0   : > { %3370 = vmatpush3.msra.mxu1 %v2688_v60 }
 0x6d1   : > { %3371 = vmatprep.subr.mxu1 %v2687_v61 }
 0x6d2   : > { %3372 = vmatpush3.msra.mxu1 %v2687_v61 }
 0x6d3   : > { %3373 = vmatprep.subr.mxu1 %v2686_v62 }
 0x6d4   : > { %3374 = vmatpush3.msra.mxu1 %v2686_v62 }
 0x6d5   : > { %3375 = vmatprep.subr.mxu1 %v2685_v63 }
 0x6d6   : > { %3376 = vmatpush3.msra.mxu1 %v2685_v63 }
 0x777   : > { %v3344_v3 = vpop.f32.mrf.mxu1 }
 0x778   : > { %v2664_v4 = vadd.f32 %v3344_v3, %v3143_v2 }
 0x779   : > { %v2658_v6 = vpop.f32.mrf.mxu1 }
 0x77a   : > { %v2670_v7 = vmul.f32 0.044715, %v2664_v4  ;;  %v2659_v9 = vadd.f32 %v3143_v2, %v2658_v6  ;;  %v2668_v24 = vmul.f32 0.5, %v2664_v4 }
 0x77c   : > { %v2672_v10 = vmul.f32 %v2670_v7, %v2664_v4  ;;  %v2669_v1 = vmul.f32 0.044715, %v2659_v9  ;;  %v2667_v22 = vmul.f32 0.5, %v2659_v9 }
 0x77e   : > { %v2674_v11 = vmul.f32 %v2672_v10, %v2664_v4  ;;  %v2671_v12 = vmul.f32 %v2669_v1, %v2659_v9 }
 0x780   : > { %v2676_v13 = vadd.f32 %v2674_v11, %v2664_v4  ;;  %v2673_v14 = vmul.f32 %v2671_v12, %v2659_v9 }
 0x782   : > { %v2675_v8 = vadd.f32 %v2673_v14, %v2659_v9  ;;  %v2678_v15 = vmul.f32 0.7978846, %v2676_v13 }
 0x784   : > { %v2677_v16 = vmul.f32 0.7978846, %v2675_v8  ;;  %3497 = vtanh.f32 %v2678_v15 }
 0x786   : > { %3499 = vtanh.f32 %v2677_v16 }
 0x791   : > { %v3498_v17 = vpop.eup %3497 }
 0x792   : > { %v2682_v21 = vadd.f32 1.0, %v3498_v17 }
 0x793   : > { %v3500_v19 = vpop.eup %3499 }
 0x794   : > { %v2681_v23 = vadd.f32 1.0, %v3500_v19  ;;  %v2684_v26 = vmul.f32 %v2682_v21, %v2668_v24 }
 0x796   : > { %v2683_v25 = vmul.f32 %v2681_v23, %v2667_v22 }
 0x798   : > { %3377 = vmatprep.mubr.f32.mxu1 %v2683_v25 }
 0x799   : > { %3378 = vmatmul.mubr.f32.vlgmr.msra.gmra.mxu1 %v2684_v26 }
 0x859   : > { %v3379_v18 = vpop.f32.mrf.mxu1 }
 0x85a   : > { %v2780_v28 = vadd.f32 %v3379_v18, %v3146_v27 }
 0x85b   : > { %v2774_v29 = vpop.f32.mrf.mxu1 }
 0x85c   : > { %v2775_v31 = vadd.f32 %v3146_v27, %v2774_v29  ;;  %v2784_v20 = vadd.f32 %v2780_v28, %v4152_v51 }
 0x85e   : > { %v2790_v34 = vsel %vm794_vm1, %v2784_v20, 0.0  ;;  %v2783_v35 = vadd.f32 %v2775_v31, %v4148_v49 }
 0x85f   : > { %2791 = vadd.xlane.f32.xlu0 %v2790_v34 }
 0x860   : > { %v2787_v36 = vsel %vm794_vm1, %v2783_v35, 0.0 }
 0x861   : > { %2788 = vadd.xlane.f32.xlu1 %v2787_v36 }
 0x8e8   : > { %v2792_v37 = vpop.xlane.xlu0 %2791 }
 0x8e9   : > { %v2794_v38 = vmul.f32 0.03125, %v2792_v37 }
 0x8ea   : > { %v2789_v39 = vpop.xlane.xlu1 %2788 }
 0x8eb   : > { %v2796_v40 = vsub.f32 %v2784_v20, %v2794_v38  ;;  %v2793_v41 = vmul.f32 0.03125, %v2789_v39 }
 0x8ed   : > { %v2795_v42 = vsub.f32 %v2783_v35, %v2793_v41  ;;  %v2798_v43 = vmul.f32 %v2796_v40, %v2796_v40 }
 0x8ef   : > { %v2802_v44 = vsel %vm794_vm1, %v2798_v43, 0.0  ;;  %v2797_v45 = vmul.f32 %v2795_v42, %v2795_v42 }
 0x8f0   : > { %2803 = vadd.xlane.f32.xlu0 %v2802_v44 }
 0x8f1   : > { %v2799_v46 = vsel %vm794_vm1, %v2797_v45, 0.0 }
 0x8f2   : > { %2800 = vadd.xlane.f32.xlu1 %v2799_v46 }
 0x8f3   : > { %3518 = shalt.err (!%p3515_p7)
}
 0x8f4   : > { %s3519_s14 = scalar_lea.hbm %s4192_s28, 1024  ;;  %s3523_s23 = scalar_lea.hbm %s4344_s27, 2048 }
 0x8f5   : > { %p3520_p9 = scmp.ne.s32.totalorder %s4192_s28, %s3519_s14  ;;  %p3524_p12 = scmp.lt.s32.totalorder %s4192_s28, %s4344_s27 }
 0x8f6   : > { %p3525_p13 = scmp.lt.s32.totalorder %s3523_s23, %s3519_s14 }
 0x8f7   : > { %p3521_p10 = pnand %p3520_p9, %p3746_p4 }
 0x8f8   : > { %p3526_p0 = por %p3525_p13, %p3524_p12 }
 0x8f9   : > { %p3522_p11 = pneg %p3521_p10 }
 0x8fb   : > { %p3527_p1 = pnand %p3526_p0, %p3522_p11 }
 0x8fd   : > { %3530 = shalt.err (!%p3527_p1)
}
 0x8fe   : > { %s3617_s30 = smov 128   ;;  %s3618_s18 = smov 8   ;;  %v3147_v0 = vld [vmem:[%s721_s16] ss:$0 sm:$0xff] }
 0x8ff   : > { %3384 = dma.vmem_to_hbm [thread:$0]  (%p3746_p4), %s4195_s2, 1024, %s4192_s28, %s4199_s29, %s3617_s30, %s3617_s30, %s3618_s18  }
 0x900   : > { %v3148_v52 = vld [vmem:[%s724_s3] ss:$0 sm:$0xff]  ;;  %s3619_s28 = smov [#allocation2]  }
 0x901   : > { %s2845_s2 = sshll.u32 %s3619_s28, 4  ;;  %s2846_s2 = int_to_ptr.vmem [resolvable:$true] %s2845_s2 }
 0x902   : > { %s3531_s16 = scalar_lea.vmem %s2846_s2, 256  ;;  %p3538_p6 = scmp.lt.s32.totalorder %s2846_s2, %s2846_s2 }
 0x903   : > { %p3532_p4 = scmp.ne.s32.totalorder %s2846_s2, %s3531_s16  ;;  %p3539_p7 = scmp.lt.s32.totalorder %s3531_s16, %s3531_s16 }
 0x905   : > { %p3533_p3 = pnand %p3532_p4, %p3736_p2  ;;  %p3540_p9 = por %p3539_p7, %p3538_p6 }
 0x907   : > { %p3534_p5 = pneg %p3533_p3 }
 0x909   : > { %p3541_p10 = pnand %p3540_p9, %p3534_p5 }
 0x979   : > { %v2804_v47 = vpop.xlane.xlu0 %2803 }
 0x97a   : > { %v2806_v48 = vmul.f32 0.03125, %v2804_v47 }
 0x97b   : > { %v2801_v49 = vpop.xlane.xlu1 %2800 }
 0x97c   : > { %v2808_v50 = vadd.f32 1e-12, %v2806_v48  ;;  %v2805_v30 = vmul.f32 0.03125, %v2801_v49 }
 0x97e   : > { %3501 = vrsqrt.f32 %v2808_v50  ;;  %v2807_v51 = vadd.f32 1e-12, %v2805_v30 }
 0x980   : > { %3503 = vrsqrt.f32 %v2807_v51 }
 0x98b   : > { %v3502_v32 = vpop.eup %3501 }
 0x98c   : > { %v2812_v5 = vmul.f32 %v3502_v32, %v2796_v40 }
 0x98d   : > { %v3504_v33 = vpop.eup %3503 }
 0x98e   : > { %v2811_v53 = vmul.f32 %v3504_v33, %v2795_v42  ;;  %v2820_v54 = vmul.f32 %v3147_v0, %v2812_v5 }
 0x990   : > { %v2819_v55 = vmul.f32 %v3147_v0, %v2811_v53  ;;  %v2828_v56 = vadd.f32 %v3148_v52, %v2820_v54 }
 0x992   : > { %v2827_v57 = vadd.f32 %v3148_v52, %v2819_v55  ;;  %2830 = vst.msk [vmem:[#allocation2 + $0x8] sm:$0xff] %vm794_vm1, %v2828_v56 }
 0x994   : > { %2829 = vst.msk [vmem:[#allocation2] sm:$0xff] %vm794_vm1, %v2827_v57 }
 0x995   : > { %3544 = shalt.err (!%p3541_p10)
}
 0x996   : > { %s4347_s29 = sld [smem:[#allocation24_spill]] }
 0x99c   : > { %3383 = dma.vmem_to_hbm [thread:$0]  (%p3736_p2), %s2846_s2, 256, %s4347_s29, [#allocation3], %s3617_s30, %s3617_s30, %s3618_s18  }
 0x99d   : > { %3580 = dma.done.wait (%p3736_p2), [#allocation3], 256  }
 0x99e   : > { %3582 = vsyncadd (%p3736_p2), [#allocation3], 4294967040 }
 0x99f PF: > { %s4348_s17 = sld [smem:[#allocation13_spill]] }
 0x9a0   : > { %s4349_s14 = sld [smem:[#allocation8_spill]] }
 0x9a5   : > { %p3394_p11 = scmp.ge.s32.totalorder %s4348_s17, 2 }
 0x9a6   : > { %s2883_s1 = sand.u32 1, %s4349_s14  }
 0x9a7   : > { %p3389_p12 = pnand %p3394_p11, %p3753_p8  ;;  %s2884_s23 = scalar_lea.sflag [#allocation5], %s2883_s1 }
 0x9a9   : > { %p3390_p13 = pneg %p3389_p12 }
 0x9ab   : > { %3584 = dma.done.wait (%p3390_p13), %s2884_s23, 1024  }
 0x9ac   : > { %3586 = vsyncadd (%p3390_p13), %s2884_s23, 4294966272  ;;  %s30_s23 = sadd.s32 1, %s4348_s17   ;;  %s4351_s18 = sld [smem:[#allocation9_spill]] }
 0x9ad   : > { %p27_p0 = scmp.ge.s32.totalorder %s30_s23, 4   ;;  %s4352_s19 = sld [smem:[#allocation10_spill]] }
 0x9ae   : > { %s4353_s20 = sld [smem:[#allocation18_spill]] }
 0x9af   : > { %s4354_s21 = sld [smem:[#allocation12_spill]]  ;;  %29 = sbr.rel (!%p27_p0) target bundleno = 13 (0xd), region = 164 }
 0x9b0   : > { %s4355_s22 = sld [smem:[#allocation15_spill]] }
 0x9b4   :  { %2889 = vsyncpa [#allocation3], 1 }
 0x9b5   :  { %2891 = vsyncpa [#allocation3 + $0x1], 1 }
 0x9b6   :  { %2892 = vsyncpa [#allocation5], 1 }
 0x9b7   :  { %2894 = vsyncpa [#allocation5 + $0x1], 1 }

</bundles_post_ra>
